<compile_context>
chip_gen: v7x
topology: tpu7x:2x2x1
jax: 0.10.0
libtpu: 0.0.40
codegen_flags: <defaults>
</compile_context>

<pallas_src>
import functools

import jax
import jax.numpy as jnp
import numpy as np
from jax.experimental import pallas as pl
from jax.experimental.pallas import tpu as pltpu

LN_EPS = 1e-5  # torch.nn.LayerNorm default


def _round_up(a, b):
    return (a + b - 1) // b * b


# ----------------------------------------------------------------------------
# Fused Pallas kernel: embedding + xinfo FFN + block-diagonal per-column heads
# ----------------------------------------------------------------------------
def _generator_kernel(C, FFN_H,
                      x_ref, m_ref, dm_ref, em_ref,
                      xw1_ref, xb1_ref, xg_ref, xbeta_ref, xw2_ref, xb2_ref,
                      hw1_ref, hb1_ref, hg_ref, hbeta_ref, hw2_ref, hb2_ref,
                      o_ref):
    mm = xw1_ref.dtype  # matmul operand dtype (bf16 by default, f32 optional)

    # ---- fused per-column embedding:
    #      xin[:, c*E:(c+1)*E] = x[:, c] * data_w[c] + mask[:, c] * emb[c+1]
    #      realized as two tiny K=C matmuls against host-packed (C, C*E) matrices.
    xin = (jnp.dot(x_ref[...], dm_ref[...], preferred_element_type=jnp.float32)
           + jnp.dot(m_ref[...], em_ref[...], preferred_element_type=jnp.float32))

    # ---- xinfo_network: Linear -> Dropout(eval: identity) -> LayerNorm -> ReLU -> Linear
    h = jnp.dot(xin.astype(mm), xw1_ref[...],
                preferred_element_type=jnp.float32) + xb1_ref[...]          # (n, FFN_H)
    mu = jnp.mean(h, axis=-1, keepdims=True)
    var = jnp.maximum(jnp.mean(h * h, axis=-1, keepdims=True) - mu * mu, 0.0)
    y = (h - mu) * (jax.lax.rsqrt(var + LN_EPS) * xg_ref[...]) + xbeta_ref[...]
    y = jnp.maximum(y, 0.0)                                                 # ReLU
    z = jnp.dot(y.astype(mm), xw2_ref[...],
                preferred_element_type=jnp.float32) + xb2_ref[...]          # (n, C*hid)

    # ---- C output heads, first Linear packed block-diagonally: (n, C*hid) -> (n, C*FFN_H)
    hh = jnp.dot(z.astype(mm), hw1_ref[...],
                 preferred_element_type=jnp.float32) + hb1_ref[...]

    # ---- per-head LayerNorm + ReLU: static loop over C with static 512-lane slices.
    #      XLU cross-lane reduces (separate VLIW slot), no indicator matmuls.
    H = FFN_H
    parts = []
    for c in range(C):
        lo, hi = c * H, (c + 1) * H
        hc = hh[:, lo:hi]
        mu_c = jnp.mean(hc, axis=-1, keepdims=True)
        var_c = jnp.maximum(jnp.mean(hc * hc, axis=-1, keepdims=True) - mu_c * mu_c, 0.0)
        yc = ((hc - mu_c) * (jax.lax.rsqrt(var_c + LN_EPS) * hg_ref[:, lo:hi])
              + hbeta_ref[:, lo:hi])
        parts.append(jnp.maximum(yc, 0.0))
    yh = jnp.concatenate(parts, axis=-1)                                    # (n, C*FFN_H)

    # ---- second head Linear, block-diagonal AND zero-padded to 128 output lanes
    #      -> unmasked lane-dense store; wrapper slices [:, :C*D].
    o_ref[...] = (jnp.dot(yh.astype(mm), hw2_ref[...],
                          preferred_element_type=jnp.float32) + hb2_ref[...])


# ----------------------------------------------------------------------------
# Parameter construction (deterministic, matches module __init__ shapes)
# ----------------------------------------------------------------------------
def init_generator_params(key, column_num, output_dim, hidden_size=16,
                          datum_emb_size=8, ffn_hidden=512,
                          matmul_dtype=jnp.bfloat16):
    C, H, hid, D, E = column_num, ffn_hidden, hidden_size, output_dim, datum_emb_size
    ks = jax.random.split(key, 14)
    sc = 0.1

    # data_input: C x Linear(1, E, bias=False) -> stacked weight (C, E)
    data_w = sc * jax.random.normal(ks[0], (C, E), jnp.float32)

    # mask_embedding: Embedding(C+1, E, padding_idx=0) -> row 0 is zeros
    emb = sc * jax.random.normal(ks[1], (C + 1, E), jnp.float32)
    emb = emb.at[0].set(0.0)

    # xinfo_network: PositionWiseFFN(E*C -> C*hid), inner hidden = ffn_hidden
    din, dout = E * C, C * hid
    xinfo = dict(
        w1=sc * jax.random.normal(ks[2], (din, H), jnp.float32),
        b1=sc * jax.random.normal(ks[3], (1, H), jnp.float32),
        gamma=1.0 + sc * jax.random.normal(ks[4], (1, H), jnp.float32),
        beta=sc * jax.random.normal(ks[5], (1, H), jnp.float32),
        w2=sc * jax.random.normal(ks[6], (H, dout), jnp.float32),
        b2=sc * jax.random.normal(ks[7], (1, dout), jnp.float32),
    )

    # output heads: C x PositionWiseFFN(hid -> output_dim)
    heads = dict(
        w1=sc * jax.random.normal(ks[8], (C, hid, H), jnp.float32),
        b1=sc * jax.random.normal(ks[9], (C, H), jnp.float32),
        gamma=1.0 + sc * jax.random.normal(ks[10], (C, H), jnp.float32),
        beta=sc * jax.random.normal(ks[11], (C, H), jnp.float32),
        w2=sc * jax.random.normal(ks[12], (C, H, D), jnp.float32),
        b2=sc * jax.random.normal(ks[13], (C, D), jnp.float32),
    )

    # ---- kernel-side packing (built once at init; no per-call casts) ----
    # Per-column embedding as K=C matmuls: xin = x @ dm + mask @ em  (kept f32, tiny)
    dm = jnp.zeros((C, C * E), jnp.float32)
    em = jnp.zeros((C, C * E), jnp.float32)
    for c in range(C):
        dm = dm.at[c, c * E:(c + 1) * E].set(data_w[c])
        em = em.at[c, c * E:(c + 1) * E].set(emb[c + 1])

    # Block-diagonal packing of the C heads.
    # NOTE: grows ~C^2 — for large C (>= ~16) use a per-head grid axis instead
    # so the weights fit v7x's 64 MiB VMEM.
    w1_bd = jnp.zeros((C * hid, C * H), jnp.float32)
    for c in range(C):
        w1_bd = w1_bd.at[c * hid:(c + 1) * hid, c * H:(c + 1) * H].set(heads["w1"][c])

    # Second head Linear: block-diag + zero-pad output columns to a multiple of 128
    # so the final store is unmasked / lane-dense.
    d_pad = max(128, _round_up(C * D, 128))
    w2_pad = jnp.zeros((C * H, d_pad), jnp.float32)
    b2_pad = jnp.zeros((1, d_pad), jnp.float32)
    for c in range(C):
        w2_pad = w2_pad.at[c * H:(c + 1) * H, c * D:(c + 1) * D].set(heads["w2"][c])
    b2_pad = b2_pad.at[0, :C * D].set(heads["b2"].reshape(-1))

    kern = dict(
        dm=dm, em=em,
        xw1=xinfo["w1"].astype(matmul_dtype), xb1=xinfo["b1"],
        xg=xinfo["gamma"], xbeta=xinfo["beta"],
        xw2=xinfo["w2"].astype(matmul_dtype), xb2=xinfo["b2"],
        hw1=w1_bd.astype(matmul_dtype), hb1=heads["b1"].reshape(1, C * H),
        hg=heads["gamma"].reshape(1, C * H), hbeta=heads["beta"].reshape(1, C * H),
        hw2=w2_pad.astype(matmul_dtype), hb2=b2_pad,
    )
    return dict(data_w=data_w, emb=emb, xinfo=xinfo, heads=heads, kernel=kern)


# ----------------------------------------------------------------------------
# Generator forward: one fused Pallas kernel (embedding + FFNs + heads)
# ----------------------------------------------------------------------------
def generator_forward(params, x, mask):
    k = params["kernel"]
    C, E = params["data_w"].shape
    FFN_H = params["xinfo"]["w1"].shape[1]
    D = params["heads"]["w2"].shape[2]
    D_PAD = k["hw2"].shape[1]
    N = x.shape[0]

    x_f = x.astype(jnp.float32)
    m_f = mask.astype(jnp.float32)

    operands = [
        x_f, m_f, k["dm"], k["em"],
        k["xw1"], k["xb1"], k["xg"], k["xbeta"], k["xw2"], k["xb2"],
        k["hw1"], k["hb1"], k["hg"], k["hbeta"], k["hw2"], k["hb2"],
    ]

    # Batch-tiled 'parallel' grid. block_n is chosen so the axis has >=2 steps for
    # moderate N (lets v7x shard rows across its 2 TensorCores); weights keep a
    # constant block index so they stay resident in VMEM.
    block_n = min(256, max(8, _round_up(pl.cdiv(N, 2), 8)))
    block_n = min(block_n, _round_up(N, 8))
    grid = (pl.cdiv(N, block_n),)

    in_specs = [pl.BlockSpec((block_n, C), lambda i: (i, 0)),
                pl.BlockSpec((block_n, C), lambda i: (i, 0))]
    in_specs += [pl.BlockSpec(op.shape, lambda i: (0, 0)) for op in operands[2:]]
    out_specs = pl.BlockSpec((block_n, D_PAD), lambda i: (i, 0))

    kernel = functools.partial(_generator_kernel, C, FFN_H)
    out_pad = pl.pallas_call(
        kernel,
        out_shape=jax.ShapeDtypeStruct((N, D_PAD), jnp.float32),
        grid=grid,
        in_specs=in_specs,
        out_specs=out_specs,
        compiler_params=pltpu.CompilerParams(
            dimension_semantics=("parallel",),
            vmem_limit_bytes=32 * 1024 * 1024),
    )(*operands)
    return out_pad[:, :C * D]


# ----------------------------------------------------------------------------
# Pure-JAX reference (per-head loop, HIGHEST precision) for correctness check
# ----------------------------------------------------------------------------
def _ffn_ref(x, w1, b1, g, beta, w2, b2):
    h = jnp.dot(x, w1, precision=jax.lax.Precision.HIGHEST) + b1
    mean = jnp.mean(h, axis=-1, keepdims=True)
    var = jnp.mean((h - mean) ** 2, axis=-1, keepdims=True)
    y = (h - mean) * jax.lax.rsqrt(var + LN_EPS) * g + beta
    y = jnp.maximum(y, 0.0)
    return jnp.dot(y, w2, precision=jax.lax.Precision.HIGHEST) + b2


def generator_reference(params, x, mask):
    C, E = params["data_w"].shape
    N = x.shape[0]
    hd = params["heads"]
    hid = hd["w1"].shape[1]
    col_ids = jnp.arange(1, C + 1, dtype=jnp.int32)
    idx = mask.astype(jnp.int32) * col_ids[None, :]
    mask_emb = jnp.take(params["emb"], idx, axis=0)
    data_emb = x[:, :, None] * params["data_w"][None, :, :]
    xin = (mask_emb + data_emb).reshape(N, C * E)
    xi = params["xinfo"]
    xout = _ffn_ref(xin, xi["w1"], xi["b1"], xi["gamma"], xi["beta"], xi["w2"], xi["b2"])
    outs = []
    for c in range(C):
        xc = xout[:, c * hid:(c + 1) * hid]
        outs.append(_ffn_ref(xc, hd["w1"][c], hd["b1"][c], hd["gamma"][c],
                             hd["beta"][c], hd["w2"][c], hd["b2"][c]))
    return jnp.concatenate(outs, axis=-1)


# ----------------------------------------------------------------------------
if __name__ == "__main__":
    N, C, OUT_DIM, HID = 8, 4, 4, 16

    key = jax.random.PRNGKey(0)
    kp, kx, km = jax.random.split(key, 3)

    # Same random base weights, stored f32 vs bf16 for the matmul path.
    params_f32 = init_generator_params(kp, column_num=C, output_dim=OUT_DIM,
                                       hidden_size=HID, matmul_dtype=jnp.float32)
    params_bf16 = init_generator_params(kp, column_num=C, output_dim=OUT_DIM,
                                        hidden_size=HID, matmul_dtype=jnp.bfloat16)

    x = jax.random.normal(kx, (N, C), jnp.float32)                   # data values
    mask = jax.random.bernoulli(km, 0.5, (N, C)).astype(jnp.int32)   # 0/1 mask

    fwd = jax.jit(generator_forward)

    ref = generator_reference(params_f32, x, mask)

    # f32-weight path: tight check (kernel matmuls at default MXU precision).
    out_f32 = jax.block_until_ready(fwd(params_f32, x, mask))
    assert out_f32.shape == (N, C * OUT_DIM), out_f32.shape
    np.testing.assert_allclose(np.asarray(out_f32), np.asarray(ref), rtol=2e-3, atol=2e-3)

    # bf16-weight path (the default / production throughput lever): ballpark check.
    out_bf16 = jax.block_until_ready(fwd(params_bf16, x, mask))
    assert out_bf16.shape == (N, C * OUT_DIM), out_bf16.shape
    np.testing.assert_allclose(np.asarray(out_bf16), np.asarray(ref), rtol=1e-1, atol=1e-1)

    print("KERNEL_OK")
</pallas_src>

<mosaic_0001>
module attributes {stable_mosaic.version = 11 : i64} {
  func.func @_generator_kernel(%arg0: i32, %arg1: memref<8x4xf32, #tpu.memory_space<vmem>>, %arg2: memref<8x4xf32, #tpu.memory_space<vmem>>, %arg3: memref<4x32xf32, #tpu.memory_space<vmem>>, %arg4: memref<4x32xf32, #tpu.memory_space<vmem>>, %arg5: memref<32x512xf32, #tpu.memory_space<vmem>>, %arg6: memref<1x512xf32, #tpu.memory_space<vmem>>, %arg7: memref<1x512xf32, #tpu.memory_space<vmem>>, %arg8: memref<1x512xf32, #tpu.memory_space<vmem>>, %arg9: memref<512x64xf32, #tpu.memory_space<vmem>>, %arg10: memref<1x64xf32, #tpu.memory_space<vmem>>, %arg11: memref<64x2048xf32, #tpu.memory_space<vmem>>, %arg12: memref<1x2048xf32, #tpu.memory_space<vmem>>, %arg13: memref<1x2048xf32, #tpu.memory_space<vmem>>, %arg14: memref<1x2048xf32, #tpu.memory_space<vmem>>, %arg15: memref<2048x128xf32, #tpu.memory_space<vmem>>, %arg16: memref<1x128xf32, #tpu.memory_space<vmem>>, %arg17: memref<8x128xf32, #tpu.memory_space<vmem>>) attributes {dimension_semantics = [#tpu.dimension_semantics<parallel>], iteration_bounds = array<i64: 1>, scalar_prefetch = 0 : i64, scratch_operands = 0 : i64, tpu.core_type = #tpu.core_type<tc>, window_params = [{transform_indices = @transform_0, window_bounds = array<i64: 8, 4>}, {transform_indices = @transform_1, window_bounds = array<i64: 8, 4>}, {pipeline_mode = #tpu.pipeline_mode<synchronous>, transform_indices = @transform_2, window_bounds = array<i64: 4, 32>}, {pipeline_mode = #tpu.pipeline_mode<synchronous>, transform_indices = @transform_3, window_bounds = array<i64: 4, 32>}, {pipeline_mode = #tpu.pipeline_mode<synchronous>, transform_indices = @transform_4, window_bounds = array<i64: 32, 512>}, {pipeline_mode = #tpu.pipeline_mode<synchronous>, transform_indices = @transform_5, window_bounds = array<i64: 1, 512>}, {pipeline_mode = #tpu.pipeline_mode<synchronous>, transform_indices = @transform_6, window_bounds = array<i64: 1, 512>}, {pipeline_mode = #tpu.pipeline_mode<synchronous>, transform_indices = @transform_7, window_bounds = array<i64: 1, 512>}, {pipeline_mode = #tpu.pipeline_mode<synchronous>, transform_indices = @transform_8, window_bounds = array<i64: 512, 64>}, {pipeline_mode = #tpu.pipeline_mode<synchronous>, transform_indices = @transform_9, window_bounds = array<i64: 1, 64>}, {pipeline_mode = #tpu.pipeline_mode<synchronous>, transform_indices = @transform_10, window_bounds = array<i64: 64, 2048>}, {pipeline_mode = #tpu.pipeline_mode<synchronous>, transform_indices = @transform_11, window_bounds = array<i64: 1, 2048>}, {pipeline_mode = #tpu.pipeline_mode<synchronous>, transform_indices = @transform_12, window_bounds = array<i64: 1, 2048>}, {pipeline_mode = #tpu.pipeline_mode<synchronous>, transform_indices = @transform_13, window_bounds = array<i64: 1, 2048>}, {pipeline_mode = #tpu.pipeline_mode<synchronous>, transform_indices = @transform_14, window_bounds = array<i64: 2048, 128>}, {pipeline_mode = #tpu.pipeline_mode<synchronous>, transform_indices = @transform_15, window_bounds = array<i64: 1, 128>}, {transform_indices = @transform_16, window_bounds = array<i64: 8, 128>}]} {
    %c0 = arith.constant 0 : index
    %c0_0 = arith.constant 0 : index
    %0 = vector.load %arg1[%c0, %c0_0] : memref<8x4xf32, #tpu.memory_space<vmem>>, vector<8x4xf32>
    %c0_1 = arith.constant 0 : index
    %c0_2 = arith.constant 0 : index
    %1 = vector.load %arg3[%c0_1, %c0_2] : memref<4x32xf32, #tpu.memory_space<vmem>>, vector<4x32xf32>
    %cst = arith.constant dense<0.000000e+00> : vector<8x32xf32>
    %2 = tpu.matmul %0, %1, %cst {dimension_numbers = #tpu.dot_dimension_numbers<[1], [0], [0], [1], [0, 0, 1, 1], [], []>} : vector<8x4xf32>, vector<4x32xf32>, vector<8x32xf32> -> vector<8x32xf32>
    %c0_3 = arith.constant 0 : index
    %c0_4 = arith.constant 0 : index
    %3 = vector.load %arg2[%c0_3, %c0_4] : memref<8x4xf32, #tpu.memory_space<vmem>>, vector<8x4xf32>
    %c0_5 = arith.constant 0 : index
    %c0_6 = arith.constant 0 : index
    %4 = vector.load %arg4[%c0_5, %c0_6] : memref<4x32xf32, #tpu.memory_space<vmem>>, vector<4x32xf32>
    %cst_7 = arith.constant dense<0.000000e+00> : vector<8x32xf32>
    %5 = tpu.matmul %3, %4, %cst_7 {dimension_numbers = #tpu.dot_dimension_numbers<[1], [0], [0], [1], [0, 0, 1, 1], [], []>} : vector<8x4xf32>, vector<4x32xf32>, vector<8x32xf32> -> vector<8x32xf32>
    %6 = arith.addf %2, %5 : vector<8x32xf32>
    %c0_8 = arith.constant 0 : index
    %c0_9 = arith.constant 0 : index
    %7 = vector.load %arg5[%c0_8, %c0_9] : memref<32x512xf32, #tpu.memory_space<vmem>>, vector<32x512xf32>
    %cst_10 = arith.constant dense<0.000000e+00> : vector<8x512xf32>
    %8 = tpu.matmul %6, %7, %cst_10 {dimension_numbers = #tpu.dot_dimension_numbers<[1], [0], [0], [1], [0, 0, 1, 1], [], []>} : vector<8x32xf32>, vector<32x512xf32>, vector<8x512xf32> -> vector<8x512xf32>
    %c0_11 = arith.constant 0 : index
    %c0_12 = arith.constant 0 : index
    %9 = vector.load %arg6[%c0_11, %c0_12] : memref<1x512xf32, #tpu.memory_space<vmem>>, vector<1x512xf32>
    %10 = vector.broadcast %9 : vector<1x512xf32> to vector<8x512xf32>
    %11 = arith.addf %8, %10 : vector<8x512xf32>
    %cst_13 = arith.constant dense<0.000000e+00> : vector<8xf32>
    %12 = vector.multi_reduction <add>, %11, %cst_13 [1] : vector<8x512xf32> to vector<8xf32>
    %13 = vector.shape_cast %12 : vector<8xf32> to vector<8x1xf32>
    %cst_14 = arith.constant 5.120000e+02 : f32
    %14 = vector.broadcast %cst_14 : f32 to vector<8x1xf32>
    %15 = arith.divf %13, %14 : vector<8x1xf32>
    %16 = arith.mulf %11, %11 : vector<8x512xf32>
    %cst_15 = arith.constant dense<0.000000e+00> : vector<8xf32>
    %17 = vector.multi_reduction <add>, %16, %cst_15 [1] : vector<8x512xf32> to vector<8xf32>
    %18 = vector.shape_cast %17 : vector<8xf32> to vector<8x1xf32>
    %cst_16 = arith.constant 5.120000e+02 : f32
    %19 = vector.broadcast %cst_16 : f32 to vector<8x1xf32>
    %20 = arith.divf %18, %19 : vector<8x1xf32>
    %21 = arith.mulf %15, %15 : vector<8x1xf32>
    %22 = arith.subf %20, %21 : vector<8x1xf32>
    %cst_17 = arith.constant 0.000000e+00 : f32
    %23 = vector.broadcast %cst_17 : f32 to vector<8x1xf32>
    %24 = arith.maximumf %22, %23 : vector<8x1xf32>
    %25 = vector.broadcast %15 : vector<8x1xf32> to vector<8x512xf32>
    %26 = arith.subf %11, %25 : vector<8x512xf32>
    %cst_18 = arith.constant 9.99999974E-6 : f32
    %27 = vector.broadcast %cst_18 : f32 to vector<8x1xf32>
    %28 = arith.addf %24, %27 : vector<8x1xf32>
    %29 = math.rsqrt %28 : vector<8x1xf32>
    %c0_19 = arith.constant 0 : index
    %c0_20 = arith.constant 0 : index
    %30 = vector.load %arg7[%c0_19, %c0_20] : memref<1x512xf32, #tpu.memory_space<vmem>>, vector<1x512xf32>
    %31 = vector.broadcast %29 : vector<8x1xf32> to vector<8x512xf32>
    %32 = vector.broadcast %30 : vector<1x512xf32> to vector<8x512xf32>
    %33 = arith.mulf %31, %32 : vector<8x512xf32>
    %34 = arith.mulf %26, %33 : vector<8x512xf32>
    %c0_21 = arith.constant 0 : index
    %c0_22 = arith.constant 0 : index
    %35 = vector.load %arg8[%c0_21, %c0_22] : memref<1x512xf32, #tpu.memory_space<vmem>>, vector<1x512xf32>
    %36 = vector.broadcast %35 : vector<1x512xf32> to vector<8x512xf32>
    %37 = arith.addf %34, %36 : vector<8x512xf32>
    %cst_23 = arith.constant 0.000000e+00 : f32
    %38 = vector.broadcast %cst_23 : f32 to vector<8x512xf32>
    %39 = arith.maximumf %37, %38 : vector<8x512xf32>
    %c0_24 = arith.constant 0 : index
    %c0_25 = arith.constant 0 : index
    %40 = vector.load %arg9[%c0_24, %c0_25] : memref<512x64xf32, #tpu.memory_space<vmem>>, vector<512x64xf32>
    %cst_26 = arith.constant dense<0.000000e+00> : vector<8x64xf32>
    %41 = tpu.matmul %39, %40, %cst_26 {dimension_numbers = #tpu.dot_dimension_numbers<[1], [0], [0], [1], [0, 0, 1, 1], [], []>} : vector<8x512xf32>, vector<512x64xf32>, vector<8x64xf32> -> vector<8x64xf32>
    %c0_27 = arith.constant 0 : index
    %c0_28 = arith.constant 0 : index
    %42 = vector.load %arg10[%c0_27, %c0_28] : memref<1x64xf32, #tpu.memory_space<vmem>>, vector<1x64xf32>
    %43 = vector.broadcast %42 : vector<1x64xf32> to vector<8x64xf32>
    %44 = arith.addf %41, %43 : vector<8x64xf32>
    %c0_29 = arith.constant 0 : index
    %c0_30 = arith.constant 0 : index
    %45 = vector.load %arg11[%c0_29, %c0_30] : memref<64x2048xf32, #tpu.memory_space<vmem>>, vector<64x2048xf32>
    %cst_31 = arith.constant dense<0.000000e+00> : vector<8x2048xf32>
    %46 = tpu.matmul %44, %45, %cst_31 {dimension_numbers = #tpu.dot_dimension_numbers<[1], [0], [0], [1], [0, 0, 1, 1], [], []>} : vector<8x64xf32>, vector<64x2048xf32>, vector<8x2048xf32> -> vector<8x2048xf32>
    %c0_32 = arith.constant 0 : index
    %c0_33 = arith.constant 0 : index
    %47 = vector.load %arg12[%c0_32, %c0_33] : memref<1x2048xf32, #tpu.memory_space<vmem>>, vector<1x2048xf32>
    %48 = vector.broadcast %47 : vector<1x2048xf32> to vector<8x2048xf32>
    %49 = arith.addf %46, %48 : vector<8x2048xf32>
    %50 = vector.extract_strided_slice %49 {offsets = [0, 0], sizes = [8, 512], strides = [1, 1]} : vector<8x2048xf32> to vector<8x512xf32>
    %cst_34 = arith.constant dense<0.000000e+00> : vector<8xf32>
    %51 = vector.multi_reduction <add>, %50, %cst_34 [1] : vector<8x512xf32> to vector<8xf32>
    %52 = vector.shape_cast %51 : vector<8xf32> to vector<8x1xf32>
    %cst_35 = arith.constant 5.120000e+02 : f32
    %53 = vector.broadcast %cst_35 : f32 to vector<8x1xf32>
    %54 = arith.divf %52, %53 : vector<8x1xf32>
    %55 = arith.mulf %50, %50 : vector<8x512xf32>
    %cst_36 = arith.constant dense<0.000000e+00> : vector<8xf32>
    %56 = vector.multi_reduction <add>, %55, %cst_36 [1] : vector<8x512xf32> to vector<8xf32>
    %57 = vector.shape_cast %56 : vector<8xf32> to vector<8x1xf32>
    %cst_37 = arith.constant 5.120000e+02 : f32
    %58 = vector.broadcast %cst_37 : f32 to vector<8x1xf32>
    %59 = arith.divf %57, %58 : vector<8x1xf32>
    %60 = arith.mulf %54, %54 : vector<8x1xf32>
    %61 = arith.subf %59, %60 : vector<8x1xf32>
    %cst_38 = arith.constant 0.000000e+00 : f32
    %62 = vector.broadcast %cst_38 : f32 to vector<8x1xf32>
    %63 = arith.maximumf %61, %62 : vector<8x1xf32>
    %64 = vector.broadcast %54 : vector<8x1xf32> to vector<8x512xf32>
    %65 = arith.subf %50, %64 : vector<8x512xf32>
    %cst_39 = arith.constant 9.99999974E-6 : f32
    %66 = vector.broadcast %cst_39 : f32 to vector<8x1xf32>
    %67 = arith.addf %63, %66 : vector<8x1xf32>
    %68 = math.rsqrt %67 : vector<8x1xf32>
    %c0_40 = arith.constant 0 : index
    %c0_41 = arith.constant 0 : index
    %69 = vector.load %arg13[%c0_40, %c0_41] : memref<1x2048xf32, #tpu.memory_space<vmem>>, vector<1x512xf32>
    %70 = vector.broadcast %68 : vector<8x1xf32> to vector<8x512xf32>
    %71 = vector.broadcast %69 : vector<1x512xf32> to vector<8x512xf32>
    %72 = arith.mulf %70, %71 : vector<8x512xf32>
    %73 = arith.mulf %65, %72 : vector<8x512xf32>
    %c0_42 = arith.constant 0 : index
    %c0_43 = arith.constant 0 : index
    %74 = vector.load %arg14[%c0_42, %c0_43] : memref<1x2048xf32, #tpu.memory_space<vmem>>, vector<1x512xf32>
    %75 = vector.broadcast %74 : vector<1x512xf32> to vector<8x512xf32>
    %76 = arith.addf %73, %75 : vector<8x512xf32>
    %cst_44 = arith.constant 0.000000e+00 : f32
    %77 = vector.broadcast %cst_44 : f32 to vector<8x512xf32>
    %78 = arith.maximumf %76, %77 : vector<8x512xf32>
    %79 = vector.extract_strided_slice %49 {offsets = [0, 512], sizes = [8, 512], strides = [1, 1]} : vector<8x2048xf32> to vector<8x512xf32>
    %cst_45 = arith.constant dense<0.000000e+00> : vector<8xf32>
    %80 = vector.multi_reduction <add>, %79, %cst_45 [1] : vector<8x512xf32> to vector<8xf32>
    %81 = vector.shape_cast %80 : vector<8xf32> to vector<8x1xf32>
    %cst_46 = arith.constant 5.120000e+02 : f32
    %82 = vector.broadcast %cst_46 : f32 to vector<8x1xf32>
    %83 = arith.divf %81, %82 : vector<8x1xf32>
    %84 = arith.mulf %79, %79 : vector<8x512xf32>
    %cst_47 = arith.constant dense<0.000000e+00> : vector<8xf32>
    %85 = vector.multi_reduction <add>, %84, %cst_47 [1] : vector<8x512xf32> to vector<8xf32>
    %86 = vector.shape_cast %85 : vector<8xf32> to vector<8x1xf32>
    %cst_48 = arith.constant 5.120000e+02 : f32
    %87 = vector.broadcast %cst_48 : f32 to vector<8x1xf32>
    %88 = arith.divf %86, %87 : vector<8x1xf32>
    %89 = arith.mulf %83, %83 : vector<8x1xf32>
    %90 = arith.subf %88, %89 : vector<8x1xf32>
    %cst_49 = arith.constant 0.000000e+00 : f32
    %91 = vector.broadcast %cst_49 : f32 to vector<8x1xf32>
    %92 = arith.maximumf %90, %91 : vector<8x1xf32>
    %93 = vector.broadcast %83 : vector<8x1xf32> to vector<8x512xf32>
    %94 = arith.subf %79, %93 : vector<8x512xf32>
    %cst_50 = arith.constant 9.99999974E-6 : f32
    %95 = vector.broadcast %cst_50 : f32 to vector<8x1xf32>
    %96 = arith.addf %92, %95 : vector<8x1xf32>
    %97 = math.rsqrt %96 : vector<8x1xf32>
    %c0_51 = arith.constant 0 : index
    %c512 = arith.constant 512 : index
    %98 = vector.load %arg13[%c0_51, %c512] : memref<1x2048xf32, #tpu.memory_space<vmem>>, vector<1x512xf32>
    %99 = vector.broadcast %97 : vector<8x1xf32> to vector<8x512xf32>
    %100 = vector.broadcast %98 : vector<1x512xf32> to vector<8x512xf32>
    %101 = arith.mulf %99, %100 : vector<8x512xf32>
    %102 = arith.mulf %94, %101 : vector<8x512xf32>
    %c0_52 = arith.constant 0 : index
    %c512_53 = arith.constant 512 : index
    %103 = vector.load %arg14[%c0_52, %c512_53] : memref<1x2048xf32, #tpu.memory_space<vmem>>, vector<1x512xf32>
    %104 = vector.broadcast %103 : vector<1x512xf32> to vector<8x512xf32>
    %105 = arith.addf %102, %104 : vector<8x512xf32>
    %cst_54 = arith.constant 0.000000e+00 : f32
    %106 = vector.broadcast %cst_54 : f32 to vector<8x512xf32>
    %107 = arith.maximumf %105, %106 : vector<8x512xf32>
    %108 = vector.extract_strided_slice %49 {offsets = [0, 1024], sizes = [8, 512], strides = [1, 1]} : vector<8x2048xf32> to vector<8x512xf32>
    %cst_55 = arith.constant dense<0.000000e+00> : vector<8xf32>
    %109 = vector.multi_reduction <add>, %108, %cst_55 [1] : vector<8x512xf32> to vector<8xf32>
    %110 = vector.shape_cast %109 : vector<8xf32> to vector<8x1xf32>
    %cst_56 = arith.constant 5.120000e+02 : f32
    %111 = vector.broadcast %cst_56 : f32 to vector<8x1xf32>
    %112 = arith.divf %110, %111 : vector<8x1xf32>
    %113 = arith.mulf %108, %108 : vector<8x512xf32>
    %cst_57 = arith.constant dense<0.000000e+00> : vector<8xf32>
    %114 = vector.multi_reduction <add>, %113, %cst_57 [1] : vector<8x512xf32> to vector<8xf32>
    %115 = vector.shape_cast %114 : vector<8xf32> to vector<8x1xf32>
    %cst_58 = arith.constant 5.120000e+02 : f32
    %116 = vector.broadcast %cst_58 : f32 to vector<8x1xf32>
    %117 = arith.divf %115, %116 : vector<8x1xf32>
    %118 = arith.mulf %112, %112 : vector<8x1xf32>
    %119 = arith.subf %117, %118 : vector<8x1xf32>
    %cst_59 = arith.constant 0.000000e+00 : f32
    %120 = vector.broadcast %cst_59 : f32 to vector<8x1xf32>
    %121 = arith.maximumf %119, %120 : vector<8x1xf32>
    %122 = vector.broadcast %112 : vector<8x1xf32> to vector<8x512xf32>
    %123 = arith.subf %108, %122 : vector<8x512xf32>
    %cst_60 = arith.constant 9.99999974E-6 : f32
    %124 = vector.broadcast %cst_60 : f32 to vector<8x1xf32>
    %125 = arith.addf %121, %124 : vector<8x1xf32>
    %126 = math.rsqrt %125 : vector<8x1xf32>
    %c0_61 = arith.constant 0 : index
    %c1024 = arith.constant 1024 : index
    %127 = vector.load %arg13[%c0_61, %c1024] : memref<1x2048xf32, #tpu.memory_space<vmem>>, vector<1x512xf32>
    %128 = vector.broadcast %126 : vector<8x1xf32> to vector<8x512xf32>
    %129 = vector.broadcast %127 : vector<1x512xf32> to vector<8x512xf32>
    %130 = arith.mulf %128, %129 : vector<8x512xf32>
    %131 = arith.mulf %123, %130 : vector<8x512xf32>
    %c0_62 = arith.constant 0 : index
    %c1024_63 = arith.constant 1024 : index
    %132 = vector.load %arg14[%c0_62, %c1024_63] : memref<1x2048xf32, #tpu.memory_space<vmem>>, vector<1x512xf32>
    %133 = vector.broadcast %132 : vector<1x512xf32> to vector<8x512xf32>
    %134 = arith.addf %131, %133 : vector<8x512xf32>
    %cst_64 = arith.constant 0.000000e+00 : f32
    %135 = vector.broadcast %cst_64 : f32 to vector<8x512xf32>
    %136 = arith.maximumf %134, %135 : vector<8x512xf32>
    %137 = vector.extract_strided_slice %49 {offsets = [0, 1536], sizes = [8, 512], strides = [1, 1]} : vector<8x2048xf32> to vector<8x512xf32>
    %cst_65 = arith.constant dense<0.000000e+00> : vector<8xf32>
    %138 = vector.multi_reduction <add>, %137, %cst_65 [1] : vector<8x512xf32> to vector<8xf32>
    %139 = vector.shape_cast %138 : vector<8xf32> to vector<8x1xf32>
    %cst_66 = arith.constant 5.120000e+02 : f32
    %140 = vector.broadcast %cst_66 : f32 to vector<8x1xf32>
    %141 = arith.divf %139, %140 : vector<8x1xf32>
    %142 = arith.mulf %137, %137 : vector<8x512xf32>
    %cst_67 = arith.constant dense<0.000000e+00> : vector<8xf32>
    %143 = vector.multi_reduction <add>, %142, %cst_67 [1] : vector<8x512xf32> to vector<8xf32>
    %144 = vector.shape_cast %143 : vector<8xf32> to vector<8x1xf32>
    %cst_68 = arith.constant 5.120000e+02 : f32
    %145 = vector.broadcast %cst_68 : f32 to vector<8x1xf32>
    %146 = arith.divf %144, %145 : vector<8x1xf32>
    %147 = arith.mulf %141, %141 : vector<8x1xf32>
    %148 = arith.subf %146, %147 : vector<8x1xf32>
    %cst_69 = arith.constant 0.000000e+00 : f32
    %149 = vector.broadcast %cst_69 : f32 to vector<8x1xf32>
    %150 = arith.maximumf %148, %149 : vector<8x1xf32>
    %151 = vector.broadcast %141 : vector<8x1xf32> to vector<8x512xf32>
    %152 = arith.subf %137, %151 : vector<8x512xf32>
    %cst_70 = arith.constant 9.99999974E-6 : f32
    %153 = vector.broadcast %cst_70 : f32 to vector<8x1xf32>
    %154 = arith.addf %150, %153 : vector<8x1xf32>
    %155 = math.rsqrt %154 : vector<8x1xf32>
    %c0_71 = arith.constant 0 : index
    %c1536 = arith.constant 1536 : index
    %156 = vector.load %arg13[%c0_71, %c1536] : memref<1x2048xf32, #tpu.memory_space<vmem>>, vector<1x512xf32>
    %157 = vector.broadcast %155 : vector<8x1xf32> to vector<8x512xf32>
    %158 = vector.broadcast %156 : vector<1x512xf32> to vector<8x512xf32>
    %159 = arith.mulf %157, %158 : vector<8x512xf32>
    %160 = arith.mulf %152, %159 : vector<8x512xf32>
    %c0_72 = arith.constant 0 : index
    %c1536_73 = arith.constant 1536 : index
    %161 = vector.load %arg14[%c0_72, %c1536_73] : memref<1x2048xf32, #tpu.memory_space<vmem>>, vector<1x512xf32>
    %162 = vector.broadcast %161 : vector<1x512xf32> to vector<8x512xf32>
    %163 = arith.addf %160, %162 : vector<8x512xf32>
    %cst_74 = arith.constant 0.000000e+00 : f32
    %164 = vector.broadcast %cst_74 : f32 to vector<8x512xf32>
    %165 = arith.maximumf %163, %164 : vector<8x512xf32>
    %166 = tpu.concatenate %78, %107, %136, %165 in 1 : vector<8x512xf32>, vector<8x512xf32>, vector<8x512xf32>, vector<8x512xf32> -> vector<8x2048xf32>
    %c0_75 = arith.constant 0 : index
    %c0_76 = arith.constant 0 : index
    %167 = vector.load %arg15[%c0_75, %c0_76] : memref<2048x128xf32, #tpu.memory_space<vmem>>, vector<2048x128xf32>
    %cst_77 = arith.constant dense<0.000000e+00> : vector<8x128xf32>
    %168 = tpu.matmul %166, %167, %cst_77 {dimension_numbers = #tpu.dot_dimension_numbers<[1], [0], [0], [1], [0, 0, 1, 1], [], []>} : vector<8x2048xf32>, vector<2048x128xf32>, vector<8x128xf32> -> vector<8x128xf32>
    %c0_78 = arith.constant 0 : index
    %c0_79 = arith.constant 0 : index
    %169 = vector.load %arg16[%c0_78, %c0_79] : memref<1x128xf32, #tpu.memory_space<vmem>>, vector<1x128xf32>
    %170 = vector.broadcast %169 : vector<1x128xf32> to vector<8x128xf32>
    %171 = arith.addf %168, %170 : vector<8x128xf32>
    %c0_80 = arith.constant 0 : index
    %c0_81 = arith.constant 0 : index
    %172 = vector.load %arg17[%c0_80, %c0_81] : memref<8x128xf32, #tpu.memory_space<vmem>>, vector<8x128xf32>
    tpu.vector_store %arg17[%c0_80, %c0_81], %171 {strides = array<i32>} : memref<8x128xf32, #tpu.memory_space<vmem>>, vector<8x128xf32>,
    return
  }
  func.func @transform_0(%arg0: i32) -> (i32, i32) {
    %c0_i32 = arith.constant 0 : i32
    %c0_i32_0 = arith.constant 0 : i32
    return %arg0, %c0_i32 : i32, i32
  }
  func.func @transform_1(%arg0: i32) -> (i32, i32) {
    %c0_i32 = arith.constant 0 : i32
    %c0_i32_0 = arith.constant 0 : i32
    return %arg0, %c0_i32 : i32, i32
  }
  func.func @transform_2(%arg0: i32) -> (i32, i32) {
    %c0_i32 = arith.constant 0 : i32
    %c0_i32_0 = arith.constant 0 : i32
    %c0_i32_1 = arith.constant 0 : i32
    return %c0_i32, %c0_i32_0 : i32, i32
  }
  func.func @transform_3(%arg0: i32) -> (i32, i32) {
    %c0_i32 = arith.constant 0 : i32
    %c0_i32_0 = arith.constant 0 : i32
    %c0_i32_1 = arith.constant 0 : i32
    return %c0_i32, %c0_i32_0 : i32, i32
  }
  func.func @transform_4(%arg0: i32) -> (i32, i32) {
    %c0_i32 = arith.constant 0 : i32
    %c0_i32_0 = arith.constant 0 : i32
    %c0_i32_1 = arith.constant 0 : i32
    return %c0_i32, %c0_i32_0 : i32, i32
  }
  func.func @transform_5(%arg0: i32) -> (i32, i32) {
    %c0_i32 = arith.constant 0 : i32
    %c0_i32_0 = arith.constant 0 : i32
    %c0_i32_1 = arith.constant 0 : i32
    return %c0_i32, %c0_i32_0 : i32, i32
  }
  func.func @transform_6(%arg0: i32) -> (i32, i32) {
    %c0_i32 = arith.constant 0 : i32
    %c0_i32_0 = arith.constant 0 : i32
    %c0_i32_1 = arith.constant 0 : i32
    return %c0_i32, %c0_i32_0 : i32, i32
  }
  func.func @transform_7(%arg0: i32) -> (i32, i32) {
    %c0_i32 = arith.constant 0 : i32
    %c0_i32_0 = arith.constant 0 : i32
    %c0_i32_1 = arith.constant 0 : i32
    return %c0_i32, %c0_i32_0 : i32, i32
  }
  func.func @transform_8(%arg0: i32) -> (i32, i32) {
    %c0_i32 = arith.constant 0 : i32
    %c0_i32_0 = arith.constant 0 : i32
    %c0_i32_1 = arith.constant 0 : i32
    return %c0_i32, %c0_i32_0 : i32, i32
  }
  func.func @transform_9(%arg0: i32) -> (i32, i32) {
    %c0_i32 = arith.constant 0 : i32
    %c0_i32_0 = arith.constant 0 : i32
    %c0_i32_1 = arith.constant 0 : i32
    return %c0_i32, %c0_i32_0 : i32, i32
  }
  func.func @transform_10(%arg0: i32) -> (i32, i32) {
    %c0_i32 = arith.constant 0 : i32
    %c0_i32_0 = arith.constant 0 : i32
    %c0_i32_1 = arith.constant 0 : i32
    return %c0_i32, %c0_i32_0 : i32, i32
  }
  func.func @transform_11(%arg0: i32) -> (i32, i32) {
    %c0_i32 = arith.constant 0 : i32
    %c0_i32_0 = arith.constant 0 : i32
    %c0_i32_1 = arith.constant 0 : i32
    return %c0_i32, %c0_i32_0 : i32, i32
  }
  func.func @transform_12(%arg0: i32) -> (i32, i32) {
    %c0_i32 = arith.constant 0 : i32
    %c0_i32_0 = arith.constant 0 : i32
    %c0_i32_1 = arith.constant 0 : i32
    return %c0_i32, %c0_i32_0 : i32, i32
  }
  func.func @transform_13(%arg0: i32) -> (i32, i32) {
    %c0_i32 = arith.constant 0 : i32
    %c0_i32_0 = arith.constant 0 : i32
    %c0_i32_1 = arith.constant 0 : i32
    return %c0_i32, %c0_i32_0 : i32, i32
  }
  func.func @transform_14(%arg0: i32) -> (i32, i32) {
    %c0_i32 = arith.constant 0 : i32
    %c0_i32_0 = arith.constant 0 : i32
    %c0_i32_1 = arith.constant 0 : i32
    return %c0_i32, %c0_i32_0 : i32, i32
  }
  func.func @transform_15(%arg0: i32) -> (i32, i32) {
    %c0_i32 = arith.constant 0 : i32
    %c0_i32_0 = arith.constant 0 : i32
    %c0_i32_1 = arith.constant 0 : i32
    return %c0_i32, %c0_i32_0 : i32, i32
  }
  func.func @transform_16(%arg0: i32) -> (i32, i32) {
    %c0_i32 = arith.constant 0 : i32
    %c0_i32_0 = arith.constant 0 : i32
    return %arg0, %c0_i32 : i32, i32
  }
}

</mosaic_0001>

<bundles_post_ra>
// kernel: generator_forward.1
= control target key start
LH: loop header
LB: loop body
LE: loop exit
PB: predicated region body
PF: predicated region fallthrough
CT: control target
= control target key end

     0   :  { %s4372_s0 = inlined_call_operand.vmem [shape: f32[8,4], index: 0, kind: input, shape index: {}]   ;;  %s4373_s1 = inlined_call_operand.vmem [shape: f32[8,4], index: 1, kind: input, shape index: {}]   ;;  %s4374_s2 = inlined_call_operand.vmem [shape: f32[4,32], index: 2, kind: input, shape index: {}]   ;;  %s4375_s3 = inlined_call_operand.vmem [shape: f32[4,32], index: 3, kind: input, shape index: {}]   ;;  %s4376_s4 = inlined_call_operand.vmem [shape: f32[32,512], index: 4, kind: input, shape index: {}]   ;;  %s4377_s5 = inlined_call_operand.vmem [shape: f32[1,512], index: 5, kind: input, shape index: {}]   ;;  %s4378_s6 = inlined_call_operand.vmem [shape: f32[1,512], index: 6, kind: input, shape index: {}]   ;;  %s4379_s7 = inlined_call_operand.vmem [shape: f32[1,512], index: 7, kind: input, shape index: {}]   ;;  %s4380_s8 = inlined_call_operand.vmem [shape: f32[512,64], index: 8, kind: input, shape index: {}]   ;;  %s4381_s9 = inlined_call_operand.vmem [shape: f32[1,64], index: 9, kind: input, shape index: {}]   ;;  %s4382_s10 = inlined_call_operand.hbm [shape: f32[64,2048], index: 10, kind: input, shape index: {}]   ;;  %s4383_s11 = inlined_call_operand.vmem [shape: f32[1,2048], index: 11, kind: input, shape index: {}]   ;;  %s4384_s12 = inlined_call_operand.vmem [shape: f32[1,2048], index: 12, kind: input, shape index: {}]   ;;  %s4385_s13 = inlined_call_operand.vmem [shape: f32[1,2048], index: 13, kind: input, shape index: {}]   ;;  %s4386_s14 = inlined_call_operand.hbm [shape: f32[2048,128], index: 14, kind: input, shape index: {}]   ;;  %s4387_s15 = inlined_call_operand.vmem [shape: f32[1,128], index: 15, kind: input, shape index: {}]   ;;  %s4388_s16 = inlined_call_operand.hbm [shape: f32[8,128], index: 16, kind: output, shape index: {}]  }
   0x1   :  { %4389 = sst [smem:[#allocation11_spill]] %s4372_s0 }
   0x2   :  { %21 = vsyncpa [#allocation3], 0 }
   0x3   :  { %22 = vsyncpa [#allocation6], 0 }
   0x4   :  { %23 = vsyncpa [#allocation4], 0  ;;  %s3620_s21 = smov [#allocation2]   ;;  %s3548_s25 = scalar_lea.hbm %s4382_s10, 16384 }
   0x5   :  { %s49_s22 = sshll.u32 %s3620_s21, 4  ;;  %p3549_p0 = scmp.ne.s32.totalorder %s4382_s10, %s3548_s25  ;;  %s50_s22 = int_to_ptr.vmem [resolvable:$true] %s49_s22 }
   0x6   :  { %p3552_p1 = scmp.lt.u32.totalorder %s3548_s25, %s4382_s10 }
   0x8   :  { %p3554_p2 = pnand %p3552_p1, %p3549_p0 }
   0xa   :  { %3557 = shalt.err (!%p3554_p2)
}
   0xb   :  { %s3558_s30 = scalar_lea.vmem %s50_s22, 16384  ;;  %p3563_p4 = scmp.lt.s32.totalorder %s50_s22, %s50_s22 }
   0xc   :  { %p3559_p3 = scmp.ne.s32.totalorder %s50_s22, %s3558_s30  ;;  %p3564_p5 = scmp.lt.s32.totalorder %s3558_s30, %s3558_s30 }
   0xe   :  { %p3565_p6 = por %p3564_p5, %p3563_p4 }
  0x10   :  { %p3566_p7 = pnand %p3565_p6, %p3559_p3 }
  0x12   :  { %3569 = shalt.err (!%p3566_p7)
}
  0x13   :  { %s3621_s0 = smov 2048   ;;  %s3622_s17 = smov 128  }
  0x14   :  { %55 = dma.hbm_to_vmem [thread:$0]  %s4382_s10, 16384, %s50_s22, [#allocation3], %s3621_s0, %s3621_s0, %s3622_s17  }
  0x15   :  { %s3623_s20 = smov [#allocation5]   ;;  %s3570_s25 = scalar_lea.hbm %s4386_s14, 32768 }
  0x16   :  { %s67_s21 = sshll.u32 %s3623_s20, 4  ;;  %p3571_p8 = scmp.ne.s32.totalorder %s4386_s14, %s3570_s25  ;;  %s68_s21 = int_to_ptr.vmem [resolvable:$true] %s67_s21 }
  0x17   :  { %p3574_p9 = scmp.lt.u32.totalorder %s3570_s25, %s4386_s14 }
  0x19   :  { %p3576_p10 = pnand %p3574_p9, %p3571_p8 }
  0x1b   :  { %3579 = shalt.err (!%p3576_p10)
}
  0x1c   :  { %s3580_s30 = scalar_lea.vmem %s68_s21, 32768  ;;  %p3585_p12 = scmp.lt.s32.totalorder %s68_s21, %s68_s21 }
  0x1d   :  { %p3581_p11 = scmp.ne.s32.totalorder %s68_s21, %s3580_s30  ;;  %p3586_p13 = scmp.lt.s32.totalorder %s3580_s30, %s3580_s30 }
  0x1f   :  { %p3587_p0 = por %p3586_p13, %p3585_p12 }
  0x21   :  { %p3588_p1 = pnand %p3587_p0, %p3581_p11 }
  0x23   :  { %3591 = shalt.err (!%p3588_p1)
}
  0x24   :  { %s3624_s10 = smov 8  }
  0x25   :  { %73 = dma.hbm_to_vmem [thread:$0]  %s4386_s14, 32768, %s68_s21, [#allocation6], %s3622_s17, %s3622_s17, %s3624_s10  }
  0x26   :  { %3614 = dma.done.wait [#allocation3], 16384  }
  0x27   :  { %3615 = vsyncadd [#allocation3], 4294950912 }
  0x28   :  { %3616 = dma.done.wait [#allocation6], 32768  }
  0x29   :  { %3617 = vsyncadd [#allocation6], 4294934528  ;;  %v3625_v0 = vmov 0.0   ;;  %vm3626_vm0 = vmmov 0   ;;  %vm90_vm1 = vcmask 1043456   ;;  %vm86_vm2 = vcmask 31744  }
  0x2a   :  { %3055 = vmatprep.subr.mxu1 %v3625_v0  ;;  %3060 = vmatprep.subr.mxu0 %v3625_v0  ;;  %v85_v1 = vld [vmem:[%s4375_s3] sm:$0xf]  ;;  %s4390_s25 = sld [smem:[#allocation11_spill]]  ;;  %v241_v5 = vld [vmem:[%s4376_s4 + $0x8] sm:$0xff]  ;;  %v243_v8 = vld [vmem:[%s4376_s4 + $0x18] sm:$0xff]  ;;  %vm278_vm3 = vcmask 261120   ;;  %v258_v34 = vlaneseq }
  0x2b   :  { %3057 = vmatprep.mubr.msk.f32.mxu1 %vm3626_vm0, %v3625_v0  ;;  %3062 = vmatprep.mubr.msk.f32.mxu0 %vm3626_vm0, %v3625_v0  ;;  %v83_v2 = vld [vmem:[%s4374_s2] sm:$0xf]  ;;  %v245_v6 = vld [vmem:[%s4376_s4 + $0x28] sm:$0xff]  ;;  %v247_v9 = vld [vmem:[%s4376_s4 + $0x38] sm:$0xff]  ;;  %vm933_vm4 = vcmask 523264  }
  0x2c   :  { %v84_v3 = vld [vmem:[%s4373_s1] sm:$0xff]  ;;  %3056 = vmatpush3.msk.msra.mxu1 %vm90_vm1, %v85_v1  ;;  %3061 = vmatpush3.msk.msra.mxu0 %vm90_vm1, %v83_v2  ;;  %v3065_v7 = vpack.c.bf16 %v245_v6, %v241_v5  ;;  %v3073_v11 = vpack.c.bf16 %v247_v9, %v243_v8  ;;  %v242_v13 = vld [vmem:[%s4376_s4 + $0x10] sm:$0xff]  ;;  %v249_v17 = vld [vmem:[%s4376_s4 + $0x48] sm:$0xff]  ;;  %v3803_v35 = vshrl.u32 %v258_v34, 7 }
  0x2d   :  { %3058 = vmatmul.mubr.msk.f32.vlgmr.msra.gmra.mrb[0].mxu1 %vm86_vm2, %v84_v3  ;;  %v240_v10 = vld [vmem:[%s4376_s4] sm:$0xff]  ;;  %v246_v14 = vld [vmem:[%s4376_s4 + $0x30] sm:$0xff]  ;;  %v253_v18 = vld [vmem:[%s4376_s4 + $0x68] sm:$0xff] }
  0x2e   :  { %v244_v12 = vld [vmem:[%s4376_s4 + $0x20] sm:$0xff]  ;;  %346 = vmatprep.mubr.f32.mxu1 %v3625_v0  ;;  %3066 = vmatprep.subr.bf16.mxu1 %v3065_v7  ;;  %v3075_v16 = vpack.c.bf16 %v246_v14, %v242_v13  ;;  %v251_v19 = vld [vmem:[%s4376_s4 + $0x58] sm:$0xff]  ;;  %v3069_v20 = vpack.c.bf16 %v253_v18, %v249_v17  ;;  %v250_v25 = vld [vmem:[%s4376_s4 + $0x50] sm:$0xff]  ;;  %v3806_v36 = vsub.s32 0, %v3803_v35  ;;  %v3812_v38 = vsub.s32 2, %v3803_v35 }
  0x2f   :  { %v3067_v15 = vpack.c.bf16 %v244_v12, %v240_v10  ;;  %3074 = vmatprep.subr.bf16.mxu0 %v3073_v11  ;;  %v255_v21 = vld [vmem:[%s4376_s4 + $0x78] sm:$0xff]  ;;  %v248_v23 = vld [vmem:[%s4376_s4 + $0x40] sm:$0xff]  ;;  %v254_v27 = vld [vmem:[%s4376_s4 + $0x70] sm:$0xff]  ;;  %v3815_v39 = vsub.s32 1, %v3803_v35  ;;  %v3821_v43 = vsub.s32 3, %v3803_v35 }
  0x30   :  { %v82_v4 = vld [vmem:[%s4390_s25] sm:$0xff]  ;;  %v3077_v22 = vpack.c.bf16 %v255_v21, %v251_v19  ;;  %v3079_v28 = vpack.c.bf16 %v254_v27, %v250_v25  ;;  %v527_v1 = vld [vmem:[%s4380_s8 + $0x88] sm:$0xff]  ;;  %v528_v12 = vld [vmem:[%s4380_s8 + $0x90] sm:$0xff] }
  0x31   :  { %3063 = vmatmul.mubr.msk.f32.vlgmr.msra.gmra.mrb[0].mxu0 %vm86_vm2, %v82_v4  ;;  %3068 = vmatpush1.bf16.msra.mxu1 %v3067_v15  ;;  %v252_v24 = vld [vmem:[%s4376_s4 + $0x60] sm:$0xff]  ;;  %v559_v4 = vld [vmem:[%s4380_s8 + $0x188] sm:$0xff]  ;;  %v529_v13 = vld [vmem:[%s4380_s8 + $0x98] sm:$0xff] }
  0x32   :  { %417 = vmatprep.mubr.f32.mxu0 %v3625_v0  ;;  %3076 = vmatpush1.bf16.msra.mxu0 %v3075_v16  ;;  %v3071_v26 = vpack.c.bf16 %v252_v24, %v248_v23  ;;  %v256_v37 = vld [vmem:[%s4377_s5] sm:$0xf]  ;;  %v511_v6 = vld [vmem:[%s4380_s8 + $0x8] sm:$0xff]  ;;  %v560_v14 = vld [vmem:[%s4380_s8 + $0x190] sm:$0xff]  ;;  %v3085_v15 = vpack.c.bf16 %v529_v13, %v528_v12 }
  0x33   :  { %3070 = vmatprep.subr.bf16.mxu1 %v3069_v20  ;;  %3078 = vmatprep.subr.bf16.mxu0 %v3077_v22  ;;  %v261_v40 = vrot.slane %v256_v37, %v3806_v36  ;;  %v269_v41 = vrot.slane %v256_v37, %v3812_v38  ;;  %v265_v42 = vrot.slane %v256_v37, %v3815_v39  ;;  %v526_v63 = vld [vmem:[%s4380_s8 + $0x80] sm:$0xff]  ;;  %v543_v10 = vld [vmem:[%s4380_s8 + $0x108] sm:$0xff]  ;;  %v561_v16 = vld [vmem:[%s4380_s8 + $0x198] sm:$0xff] }
  0x34   :  { %v273_v51 = vrot.slane %v256_v37, %v3821_v43  ;;  %v558_v2 = vld [vmem:[%s4380_s8 + $0x180] sm:$0xff]  ;;  %v3081_v3 = vpack.c.bf16 %v527_v1, %v526_v63  ;;  %v512_v17 = vld [vmem:[%s4380_s8 + $0x10] sm:$0xff]  ;;  %v513_v18 = vld [vmem:[%s4380_s8 + $0x18] sm:$0xff]  ;;  %v3117_v19 = vpack.c.bf16 %v561_v16, %v560_v14 }
  0x35   :  { %3072 = vmatpush1.bf16.msra.mxu1 %v3071_v26  ;;  %v510_v5 = vld [vmem:[%s4380_s8] sm:$0xff]  ;;  %v3113_v7 = vpack.c.bf16 %v559_v4, %v558_v2  ;;  %v3087_v20 = vpack.c.bf16 %v513_v18, %v512_v17  ;;  %v544_v21 = vld [vmem:[%s4380_s8 + $0x110] sm:$0xff]  ;;  %v545_v22 = vld [vmem:[%s4380_s8 + $0x118] sm:$0xff] }
  0x36   :  { %3080 = vmatpush1.bf16.msra.mxu0 %v3079_v28  ;;  %v3083_v8 = vpack.c.bf16 %v511_v6, %v510_v5  ;;  %v542_v9 = vld [vmem:[%s4380_s8 + $0x100] sm:$0xff]  ;;  %3082 = vmatprep.subr.bf16.mxu1 %v3081_v3  ;;  %v3119_v23 = vpack.c.bf16 %v545_v22, %v544_v21  ;;  %v531_v25 = vld [vmem:[%s4380_s8 + $0xa8] sm:$0xff]  ;;  %v536_v5 = vld [vmem:[%s4380_s8 + $0xd0] sm:$0xff] }
  0x37   :  { %v3115_v11 = vpack.c.bf16 %v543_v10, %v542_v9  ;;  %3114 = vmatprep.subr.bf16.mxu0 %v3113_v7  ;;  %v530_v24 = vld [vmem:[%s4380_s8 + $0xa0] sm:$0xff]  ;;  %v563_v28 = vld [vmem:[%s4380_s8 + $0x1a8] sm:$0xff]  ;;  %v537_v7 = vld [vmem:[%s4380_s8 + $0xd8] sm:$0xff] }
  0x38   :  { %v562_v26 = vld [vmem:[%s4380_s8 + $0x1a0] sm:$0xff]  ;;  %v3089_v27 = vpack.c.bf16 %v531_v25, %v530_v24  ;;  %v547_v34 = vld [vmem:[%s4380_s8 + $0x128] sm:$0xff]  ;;  %v569_v9 = vld [vmem:[%s4380_s8 + $0x1d8] sm:$0xff]  ;;  %v3101_v10 = vpack.c.bf16 %v537_v7, %v536_v5 }
  0x39   :  { %v519_v63 = vld [vmem:[%s4380_s8 + $0x48] sm:$0xff]  ;;  %v550_v3 = vld [vmem:[%s4380_s8 + $0x140] sm:$0xff]  ;;  %v520_v12 = vld [vmem:[%s4380_s8 + $0x50] sm:$0xff] }
  0x3a   :  { %v551_v4 = vld [vmem:[%s4380_s8 + $0x148] sm:$0xff]  ;;  %v521_v13 = vld [vmem:[%s4380_s8 + $0x58] sm:$0xff]  ;;  %v552_v14 = vld [vmem:[%s4380_s8 + $0x150] sm:$0xff] }
  0x3b   :  { %v3131_v6 = vpack.c.bf16 %v551_v4, %v550_v3  ;;  %v553_v16 = vld [vmem:[%s4380_s8 + $0x158] sm:$0xff]  ;;  %v538_v17 = vld [vmem:[%s4380_s8 + $0xe0] sm:$0xff]  ;;  %v539_v18 = vld [vmem:[%s4380_s8 + $0xe8] sm:$0xff] }
  0x3c   :  { %v570_v21 = vld [vmem:[%s4380_s8 + $0x1e0] sm:$0xff]  ;;  %v571_v22 = vld [vmem:[%s4380_s8 + $0x1e8] sm:$0xff] }
  0x3d   :  { %v3137_v24 = vpack.c.bf16 %v571_v22, %v570_v21  ;;  %v523_v25 = vld [vmem:[%s4380_s8 + $0x68] sm:$0xff]  ;;  %v480_v3 = vld [vmem:[%s4379_s7] sm:$0xf] }
  0x3e   :  { %v721_v21 = vld [vmem:[#allocation2] sm:$0xff] }
 0x100   :  { %v160_v29 = vpop.f32.mrb[0].mxu1 }
 0x101   :  { %v3059_v32 = vpop.f32.mrb[1].mxu1 }
 0x104   :  { %v236_v30 = vpop.f32.mrb[0].mxu0 }
 0x105   :  { %v237_v31 = vadd.f32 %v236_v30, %v160_v29  ;;  %v3064_v33 = vpop.f32.mrb[1].mxu0  ;;  %v514_v29 = vld [vmem:[%s4380_s8 + $0x20] sm:$0xff]  ;;  %v515_v30 = vld [vmem:[%s4380_s8 + $0x28] sm:$0xff] }
 0x106   :  { %v3091_v32 = vpack.c.bf16 %v515_v30, %v514_v29  ;;  %v546_v33 = vld [vmem:[%s4380_s8 + $0x120] sm:$0xff]  ;;  %v541_v29 = vld [vmem:[%s4380_s8 + $0xf8] sm:$0xff]  ;;  %v572_v30 = vld [vmem:[%s4380_s8 + $0x1f0] sm:$0xff] }
 0x107   :  { %2689 = vmatmul.mubr.msk.f32.vlgmr.msra.gmra.mrb[2].mxu1 %vm278_vm3, %v237_v31  ;;  %2690 = vmatmul.mubr.msk.f32.vlgmr.msra.gmra.mrb[2].mxu0 %vm278_vm3, %v237_v31  ;;  %v3121_v31 = vpack.c.bf16 %v563_v28, %v562_v26  ;;  %v3123_v37 = vpack.c.bf16 %v547_v34, %v546_v33  ;;  %v554_v26 = vld [vmem:[%s4380_s8 + $0x160] sm:$0xff]  ;;  %v540_v28 = vld [vmem:[%s4380_s8 + $0xf0] sm:$0xff] }
 0x108   :  { %3084 = vmatpush3.bf16.msra.mxu1 %v3083_v8  ;;  %3116 = vmatpush3.bf16.msra.mxu0 %v3115_v11  ;;  %v568_v8 = vld [vmem:[%s4380_s8 + $0x1d0] sm:$0xff]  ;;  %v3109_v34 = vpack.c.bf16 %v541_v29, %v540_v28  ;;  %v754_v29 = vld [vmem:[#allocation2 + $0x108] sm:$0xff] }
 0x109   :  { %3086 = vmatprep.subr.bf16.mxu1 %v3085_v15  ;;  %3118 = vmatprep.subr.bf16.mxu0 %v3117_v19  ;;  %v3133_v11 = vpack.c.bf16 %v569_v9, %v568_v8  ;;  %v3103_v15 = vpack.c.bf16 %v521_v13, %v520_v12  ;;  %v3135_v19 = vpack.c.bf16 %v553_v16, %v552_v14  ;;  %v739_v28 = vld [vmem:[#allocation2 + $0x90] sm:$0xff] }
 0x10a   :  { %v489_v8 = vrot.slane %v480_v3, %v3815_v39  ;;  %v497_v9 = vrot.slane %v480_v3, %v3821_v43 }
 0x10c   :  { %3088 = vmatpush3.bf16.msra.mxu1 %v3087_v20  ;;  %3120 = vmatpush3.bf16.msra.mxu0 %v3119_v23  ;;  %v3105_v20 = vpack.c.bf16 %v539_v18, %v538_v17  ;;  %v522_v23 = vld [vmem:[%s4380_s8 + $0x60] sm:$0xff] }
 0x10d   :  { %3090 = vmatprep.subr.bf16.mxu1 %v3089_v27  ;;  %3122 = vmatprep.subr.bf16.mxu0 %v3121_v31  ;;  %v555_v27 = vld [vmem:[%s4380_s8 + $0x168] sm:$0xff]  ;;  %v3107_v31 = vpack.c.bf16 %v523_v25, %v522_v23 }
 0x10e   :  { %v3139_v33 = vpack.c.bf16 %v555_v27, %v554_v26  ;;  %v737_v26 = vld [vmem:[#allocation2 + $0x80] sm:$0xff]  ;;  %v723_v27 = vld [vmem:[#allocation2 + $0x10] sm:$0xff] }
 0x110   :  { %3092 = vmatpush3.bf16.msra.mxu1 %v3091_v32  ;;  %3124 = vmatpush3.bf16.msra.mxu0 %v3123_v37  ;;  %v573_v32 = vld [vmem:[%s4380_s8 + $0x1f8] sm:$0xff]  ;;  %v524_v37 = vld [vmem:[%s4380_s8 + $0x70] sm:$0xff] }
 0x1da   :  { %v348_v44 = vpop.f32.mrb[2].mxu1  ;;  %v419_v45 = vpop.f32.mrb[2].mxu0 }
 0x1db   :  { %v3823_v46 = vadd.f32 %v348_v44, %v261_v40  ;;  %v350_v47 = vpop.f32.mrb[3].mxu1  ;;  %v421_v48 = vpop.f32.mrb[3].mxu0  ;;  %v3825_v49 = vadd.f32 %v419_v45, %v269_v41  ;;  %v532_v40 = vld [vmem:[%s4380_s8 + $0xb0] sm:$0xff]  ;;  %v533_v41 = vld [vmem:[%s4380_s8 + $0xb8] sm:$0xff] }
 0x1dc   :  { %v3827_v50 = vadd.f32 %v350_v47, %v265_v42  ;;  %v3838_v56 = vadd.f32 %v421_v48, %v273_v51  ;;  %v564_v42 = vld [vmem:[%s4380_s8 + $0x1b0] sm:$0xff]  ;;  %v3093_v44 = vpack.c.bf16 %v533_v41, %v532_v40  ;;  %v565_v45 = vld [vmem:[%s4380_s8 + $0x1b8] sm:$0xff]  ;;  %v3141_v41 = vpack.c.bf16 %v573_v32, %v572_v30 }
 0x1dd   :  { %v431_v52 = vmul.f32 %v3823_v46, %v3823_v46  ;;  %v433_v55 = vmul.f32 %v3825_v49, %v3825_v49  ;;  %v516_v47 = vld [vmem:[%s4380_s8 + $0x30] sm:$0xff]  ;;  %v517_v48 = vld [vmem:[%s4380_s8 + $0x38] sm:$0xff]  ;;  %v3125_v51 = vpack.c.bf16 %v565_v45, %v564_v42 }
 0x1de   :  { %v432_v53 = vmul.f32 %v3827_v50, %v3827_v50  ;;  %v424_v54 = vadd.f32 %v3827_v50, %v3823_v46  ;;  %v434_v61 = vmul.f32 %v3838_v56, %v3838_v56  ;;  %3094 = vmatprep.subr.bf16.mxu1 %v3093_v44  ;;  %v525_v40 = vld [vmem:[%s4380_s8 + $0x78] sm:$0xff]  ;;  %v556_v42 = vld [vmem:[%s4380_s8 + $0x170] sm:$0xff] }
 0x1df   :  { %3126 = vmatprep.subr.bf16.mxu0 %v3125_v51  ;;  %v557_v44 = vld [vmem:[%s4380_s8 + $0x178] sm:$0xff]  ;;  %v3111_v45 = vpack.c.bf16 %v525_v40, %v524_v37  ;;  %v738_v51 = vld [vmem:[#allocation2 + $0x88] sm:$0xff] }
 0x1e0   :  { %v425_v57 = vadd.f32 %v424_v54, %v3825_v49  ;;  %v435_v58 = vadd.f32 %v432_v53, %v431_v52  ;;  %v3095_v52 = vpack.c.bf16 %v517_v48, %v516_v47  ;;  %v548_v53 = vld [vmem:[%s4380_s8 + $0x130] sm:$0xff]  ;;  %v549_v54 = vld [vmem:[%s4380_s8 + $0x138] sm:$0xff]  ;;  %v3143_v47 = vpack.c.bf16 %v557_v44, %v556_v42  ;;  %v722_v48 = vld [vmem:[#allocation2 + $0x8] sm:$0xff] }
 0x1e1   :  { %v756_v32 = vld [vmem:[#allocation2 + $0x118] sm:$0xff]  ;;  %v753_v44 = vld [vmem:[#allocation2 + $0x100] sm:$0xff] }
 0x1e2   :  { %v426_v59 = vadd.f32 %v425_v57, %v3838_v56  ;;  %v436_v60 = vadd.f32 %v435_v58, %v433_v55  ;;  %v3127_v55 = vpack.c.bf16 %v549_v54, %v548_v53  ;;  %v534_v57 = vld [vmem:[%s4380_s8 + $0xc0] sm:$0xff]  ;;  %v535_v58 = vld [vmem:[%s4380_s8 + $0xc8] sm:$0xff]  ;;  %3096 = vmatpush3.bf16.msra.mxu1 %v3095_v52  ;;  %v724_v52 = vld [vmem:[#allocation2 + $0x18] sm:$0xff]  ;;  %v3145_v53 = vpack.c.bf16 %v738_v51, %v722_v48 }
 0x1e3   :  { %v740_v54 = vld [vmem:[#allocation2 + $0x98] sm:$0xff]  ;;  %v755_v51 = vld [vmem:[#allocation2 + $0x110] sm:$0xff] }
 0x1e4   :  { %427 = vadd.xlane.f32.xlu0 %v426_v59  ;;  %v437_v62 = vadd.f32 %v436_v60, %v434_v61  ;;  %v566_v59 = vld [vmem:[%s4380_s8 + $0x1c0] sm:$0xff]  ;;  %v3097_v60 = vpack.c.bf16 %v535_v58, %v534_v57  ;;  %v567_v61 = vld [vmem:[%s4380_s8 + $0x1c8] sm:$0xff]  ;;  %3128 = vmatpush3.bf16.msra.mxu0 %v3127_v55  ;;  %v3161_v55 = vpack.c.bf16 %v740_v54, %v724_v52  ;;  %v771_v52 = vld [vmem:[#allocation2 + $0x190] sm:$0xff] }
 0x1e5   :  { %v3129_v1 = vpack.c.bf16 %v567_v61, %v566_v59  ;;  %v802_v54 = vld [vmem:[#allocation2 + $0x288] sm:$0xff] }
 0x1e6   :  { %3098 = vmatprep.subr.bf16.mxu1 %v3097_v60 }
 0x1e7   :  { %3130 = vmatprep.subr.bf16.mxu0 %v3129_v1 }
 0x1e8   :  { %438 = vadd.xlane.f32.xlu0 %v437_v62  ;;  %v518_v62 = vld [vmem:[%s4380_s8 + $0x40] sm:$0xff]  ;;  %3132 = vmatpush3.bf16.msra.mxu0 %v3131_v6 }
 0x1e9   :  { %v3099_v2 = vpack.c.bf16 %v519_v63, %v518_v62  ;;  %3134 = vmatprep.subr.bf16.mxu0 %v3133_v11  ;;  %v493_v11 = vrot.slane %v480_v3, %v3812_v38 }
 0x1eb   :  { %3100 = vmatpush3.bf16.msra.mxu1 %v3099_v2  ;;  %v450_v2 = vld [vmem:[%s4378_s6] sm:$0xf] }
 0x1ec   :  { %3102 = vmatprep.subr.bf16.mxu1 %v3101_v10  ;;  %3136 = vmatpush3.bf16.msra.mxu0 %v3135_v19  ;;  %v459_v4 = vrot.slane %v450_v2, %v3815_v39  ;;  %v467_v5 = vrot.slane %v450_v2, %v3821_v43  ;;  %v455_v6 = vrot.slane %v450_v2, %v3806_v36 }
 0x1ed   :  { %3138 = vmatprep.subr.bf16.mxu0 %v3137_v24  ;;  %v463_v7 = vrot.slane %v450_v2, %v3812_v38  ;;  %v485_v10 = vrot.slane %v480_v3, %v3806_v36  ;;  %v803_v3 = vld [vmem:[#allocation2 + $0x290] sm:$0xff] }
 0x1ef   :  { %3104 = vmatpush3.bf16.msra.mxu1 %v3103_v15 }
 0x1f0   :  { %3106 = vmatprep.subr.bf16.mxu1 %v3105_v20  ;;  %3140 = vmatpush3.bf16.msra.mxu0 %v3139_v33  ;;  %v3147_v33 = vpack.c.bf16 %v737_v26, %v721_v21  ;;  %v744_v21 = vld [vmem:[#allocation2 + $0xb8] sm:$0xff] }
 0x1f1   :  { %3142 = vmatprep.subr.bf16.mxu0 %v3141_v41 }
 0x1f3   :  { %3108 = vmatpush3.bf16.msra.mxu1 %v3107_v31 }
 0x1f4   :  { %3110 = vmatprep.subr.bf16.mxu1 %v3109_v34  ;;  %3144 = vmatpush3.bf16.msra.mxu0 %v3143_v47  ;;  %v3163_v34 = vpack.c.bf16 %v739_v28, %v723_v27  ;;  %v725_v28 = vld [vmem:[#allocation2 + $0x20] sm:$0xff] }
 0x1f5   :  { %3162 = vmatprep.subr.bf16.mxu0 %v3161_v55  ;;  %v788_v55 = vld [vmem:[#allocation2 + $0x218] sm:$0xff] }
 0x1f7   :  { %3112 = vmatpush3.bf16.msra.mxu1 %v3111_v45  ;;  %v769_v45 = vld [vmem:[#allocation2 + $0x180] sm:$0xff] }
 0x1f8   :  { %3146 = vmatprep.subr.bf16.mxu1 %v3145_v53  ;;  %v786_v53 = vld [vmem:[#allocation2 + $0x208] sm:$0xff] }
 0x271   :  { %v428_v57 = vpop.xlane.xlu0 %427 }
 0x272   :  { %v430_v58 = vmul.f32 0.001953125, %v428_v57  ;;  %v804_v57 = vld [vmem:[#allocation2 + $0x298] sm:$0xff] }
 0x274   :  { %v441_v60 = vmul.f32 %v430_v58, %v430_v58  ;;  %v445_v13 = vsub.f32 %v3827_v50, %v430_v58  ;;  %v447_v14 = vsub.f32 %v3838_v56, %v430_v58  ;;  %v444_v15 = vsub.f32 %v3823_v46, %v430_v58  ;;  %v770_v46 = vld [vmem:[#allocation2 + $0x188] sm:$0xff] }
 0x275   :  { %v439_v59 = vpop.xlane.xlu0 %438  ;;  %v446_v16 = vsub.f32 %v3825_v49, %v430_v58  ;;  %v772_v49 = vld [vmem:[#allocation2 + $0x198] sm:$0xff]  ;;  %v3149_v47 = vpack.c.bf16 %v770_v46, %v754_v29  ;;  %v3151_v58 = vpack.c.bf16 %v769_v45, %v753_v44  ;;  %v741_v29 = vld [vmem:[#allocation2 + $0xa0] sm:$0xff]  ;;  %v758_v46 = vld [vmem:[#allocation2 + $0x128] sm:$0xff] }
 0x276   :  { %v440_v61 = vmul.f32 0.001953125, %v439_v59  ;;  %v3165_v48 = vpack.c.bf16 %v772_v49, %v756_v32  ;;  %v3167_v59 = vpack.c.bf16 %v771_v52, %v755_v51  ;;  %v774_v32 = vld [vmem:[#allocation2 + $0x1a8] sm:$0xff]  ;;  %v760_v49 = vld [vmem:[#allocation2 + $0x138] sm:$0xff]  ;;  %v775_v51 = vld [vmem:[#allocation2 + $0x1b0] sm:$0xff] }
 0x277   :  { %v3181_v45 = vpack.c.bf16 %v774_v32, %v758_v46  ;;  %v790_v52 = vld [vmem:[#allocation2 + $0x228] sm:$0xff] }
 0x278   :  { %v442_v62 = vsub.f32 %v440_v61, %v441_v60  ;;  %v3153_v60 = vpack.c.bf16 %v802_v54, %v786_v53  ;;  %v3169_v61 = vpack.c.bf16 %v804_v57, %v788_v55  ;;  %v806_v53 = vld [vmem:[#allocation2 + $0x2a8] sm:$0xff]  ;;  %v792_v54 = vld [vmem:[#allocation2 + $0x238] sm:$0xff] }
 0x279   :  { %v808_v55 = vld [vmem:[#allocation2 + $0x2b8] sm:$0xff] }
 0x27a   :  { %v443_v63 = vmax.f32 %v442_v62, 0.0  ;;  %v785_v62 = vld [vmem:[#allocation2 + $0x200] sm:$0xff] }
 0x27c   :  { %v448_v1 = vadd.f32 1e-05, %v443_v63  ;;  %v801_v63 = vld [vmem:[#allocation2 + $0x280] sm:$0xff] }
 0x27d   :  { %v3155_v2 = vpack.c.bf16 %v801_v63, %v785_v62  ;;  %v3201_v62 = vpack.c.bf16 %v808_v55, %v792_v54  ;;  %v791_v63 = vld [vmem:[#allocation2 + $0x230] sm:$0xff]  ;;  %v826_v55 = vld [vmem:[#allocation2 + $0x348] sm:$0xff] }
 0x27e   :  { %3538 = vrsqrt.f32 %v448_v1  ;;  %v787_v1 = vld [vmem:[#allocation2 + $0x210] sm:$0xff] }
 0x27f   :  { %v811_v54 = vld [vmem:[#allocation2 + $0x2d0] sm:$0xff] }
 0x288   :  { %v3539_v12 = vpop.eup %3538 }
 0x289   :  { %v473_v17 = vmul.f32 %v3539_v12, %v459_v4  ;;  %v475_v18 = vmul.f32 %v3539_v12, %v467_v5  ;;  %v472_v19 = vmul.f32 %v3539_v12, %v455_v6  ;;  %v474_v20 = vmul.f32 %v3539_v12, %v463_v7  ;;  %v818_v5 = vld [vmem:[#allocation2 + $0x308] sm:$0xff]  ;;  %v820_v7 = vld [vmem:[#allocation2 + $0x318] sm:$0xff] }
 0x28a   :  { %v3171_v4 = vpack.c.bf16 %v803_v3, %v787_v1  ;;  %v834_v6 = vld [vmem:[#allocation2 + $0x388] sm:$0xff]  ;;  %v807_v1 = vld [vmem:[#allocation2 + $0x2b0] sm:$0xff] }
 0x28b   :  { %v477_v22 = vmul.f32 %v473_v17, %v445_v13  ;;  %v479_v23 = vmul.f32 %v475_v18, %v447_v14  ;;  %v476_v24 = vmul.f32 %v472_v19, %v444_v15  ;;  %v478_v25 = vmul.f32 %v474_v20, %v446_v16  ;;  %v819_v14 = vld [vmem:[#allocation2 + $0x310] sm:$0xff]  ;;  %v726_v17 = vld [vmem:[#allocation2 + $0x28] sm:$0xff]  ;;  %v728_v19 = vld [vmem:[#allocation2 + $0x38] sm:$0xff] }
 0x28c   :  { %v835_v15 = vld [vmem:[#allocation2 + $0x390] sm:$0xff]  ;;  %v742_v18 = vld [vmem:[#allocation2 + $0xa8] sm:$0xff] }
 0x28d   :  { %v503_v50 = vadd.f32 %v489_v8, %v477_v22  ;;  %v505_v30 = vadd.f32 %v497_v9, %v479_v23  ;;  %v502_v56 = vadd.f32 %v485_v10, %v476_v24  ;;  %v504_v31 = vadd.f32 %v493_v11, %v478_v25  ;;  %v836_v9 = vld [vmem:[#allocation2 + $0x398] sm:$0xff]  ;;  %v817_v10 = vld [vmem:[#allocation2 + $0x300] sm:$0xff]  ;;  %v838_v3 = vld [vmem:[#allocation2 + $0x3a8] sm:$0xff] }
 0x28e   :  { %v3157_v8 = vpack.c.bf16 %v834_v6, %v818_v5  ;;  %v833_v11 = vld [vmem:[#allocation2 + $0x380] sm:$0xff]  ;;  %v3173_v12 = vpack.c.bf16 %v836_v9, %v820_v7  ;;  %v3175_v16 = vpack.c.bf16 %v835_v15, %v819_v14  ;;  %v3177_v20 = vpack.c.bf16 %v742_v18, %v726_v17  ;;  %v840_v5 = vld [vmem:[#allocation2 + $0x3b8] sm:$0xff]  ;;  %v730_v14 = vld [vmem:[#allocation2 + $0x48] sm:$0xff] }
 0x28f   :  { %v507_v37 = vmax.f32 %v503_v50, 0.0  ;;  %v509_v40 = vmax.f32 %v505_v30, 0.0  ;;  %v506_v41 = vmax.f32 %v502_v56, 0.0  ;;  %v508_v42 = vmax.f32 %v504_v31, 0.0  ;;  %v2691_v25 = vld [vmem:[%s4381_s9] ss:$0 sm:$0xff] }
 0x290   :  { %v3159_v13 = vpack.c.bf16 %v833_v11, %v817_v10  ;;  %v3193_v22 = vpack.c.bf16 %v744_v21, %v728_v19  ;;  %v727_v56 = vld [vmem:[#allocation2 + $0x30] sm:$0xff]  ;;  %v3203_v7 = vpack.c.bf16 %v807_v1, %v791_v63  ;;  %v837_v9 = vld [vmem:[#allocation2 + $0x3a0] sm:$0xff]  ;;  %v746_v15 = vld [vmem:[#allocation2 + $0xc8] sm:$0xff] }
 0x291   :  { %645 = vmatprep.mubr.f32.mxu1 %v507_v37  ;;  %715 = vmatprep.mubr.f32.mxu0 %v509_v40  ;;  %v743_v31 = vld [vmem:[#allocation2 + $0xb0] sm:$0xff]  ;;  %v3179_v37 = vpack.c.bf16 %v741_v29, %v725_v28  ;;  %v748_v17 = vld [vmem:[#allocation2 + $0xd8] sm:$0xff]  ;;  %v745_v21 = vld [vmem:[#allocation2 + $0xc0] sm:$0xff] }
 0x292   :  { %646 = vmatmul.mubr.f32.vlgmr.msra.gmra.mrb[4].mxu1 %v506_v41  ;;  %716 = vmatmul.mubr.f32.vlgmr.msra.gmra.mrb[4].mxu0 %v508_v42  ;;  %v3195_v40 = vpack.c.bf16 %v743_v31, %v727_v56  ;;  %v757_v41 = vld [vmem:[#allocation2 + $0x120] sm:$0xff]  ;;  %v764_v28 = vld [vmem:[#allocation2 + $0x158] sm:$0xff] }
 0x293   :  { %3148 = vmatpush1.bf16.msra.mxu1 %v3147_v33  ;;  %3164 = vmatpush1.bf16.msra.mxu0 %v3163_v34  ;;  %v776_v33 = vld [vmem:[#allocation2 + $0x1b8] sm:$0xff]  ;;  %v773_v42 = vld [vmem:[#allocation2 + $0x1a0] sm:$0xff] }
 0x294   :  { %3150 = vmatprep.subr.bf16.mxu1 %v3149_v47  ;;  %3166 = vmatprep.subr.bf16.mxu0 %v3165_v48  ;;  %v3197_v47 = vpack.c.bf16 %v776_v33, %v760_v49  ;;  %v759_v48 = vld [vmem:[#allocation2 + $0x130] sm:$0xff]  ;;  %v3183_v57 = vpack.c.bf16 %v773_v42, %v757_v41  ;;  %v780_v29 = vld [vmem:[#allocation2 + $0x1d8] sm:$0xff]  ;;  %v761_v56 = vld [vmem:[#allocation2 + $0x140] sm:$0xff] }
 0x295   :  { %1001 = vmatprep.mubr.f32.mxu1 %v3625_v0  ;;  %1072 = vmatprep.mubr.f32.mxu0 %v3625_v0  ;;  %v777_v31 = vld [vmem:[#allocation2 + $0x1c0] sm:$0xff]  ;;  %v3229_v32 = vpack.c.bf16 %v780_v29, %v764_v28  ;;  %v763_v49 = vld [vmem:[#allocation2 + $0x150] sm:$0xff]  ;;  %v812_v41 = vld [vmem:[#allocation2 + $0x2d8] sm:$0xff] }
 0x296   :  { %v779_v33 = vld [vmem:[#allocation2 + $0x1d0] sm:$0xff]  ;;  %v3215_v42 = vpack.c.bf16 %v777_v31, %v761_v56  ;;  %v841_v63 = vld [vmem:[#allocation2 + $0x3c0] sm:$0xff]  ;;  %v798_v29 = vld [vmem:[#allocation2 + $0x268] sm:$0xff] }
 0x297   :  { %3152 = vmatpush1.bf16.msra.mxu1 %v3151_v58  ;;  %3168 = vmatpush1.bf16.msra.mxu0 %v3167_v59  ;;  %v3199_v58 = vpack.c.bf16 %v775_v51, %v759_v48  ;;  %v789_v59 = vld [vmem:[#allocation2 + $0x220] sm:$0xff]  ;;  %v783_v28 = vld [vmem:[#allocation2 + $0x1f0] sm:$0xff]  ;;  %v816_v56 = vld [vmem:[#allocation2 + $0x2f8] sm:$0xff] }
 0x298   :  { %3154 = vmatprep.subr.bf16.mxu1 %v3153_v60  ;;  %3170 = vmatprep.subr.bf16.mxu0 %v3169_v61  ;;  %v805_v60 = vld [vmem:[#allocation2 + $0x2a0] sm:$0xff]  ;;  %v3185_v61 = vpack.c.bf16 %v806_v53, %v790_v52  ;;  %v795_v53 = vld [vmem:[#allocation2 + $0x250] sm:$0xff] }
 0x299   :  { %v3187_v6 = vpack.c.bf16 %v805_v60, %v789_v59  ;;  %v809_v48 = vld [vmem:[#allocation2 + $0x2c0] sm:$0xff]  ;;  %v844_v59 = vld [vmem:[#allocation2 + $0x3d8] sm:$0xff] }
 0x29b   :  { %3156 = vmatpush1.bf16.msra.mxu1 %v3155_v2  ;;  %3172 = vmatpush1.bf16.msra.mxu0 %v3171_v4  ;;  %v822_v2 = vld [vmem:[#allocation2 + $0x328] sm:$0xff]  ;;  %v824_v4 = vld [vmem:[#allocation2 + $0x338] sm:$0xff] }
 0x29c   :  { %3158 = vmatprep.subr.bf16.mxu1 %v3157_v8  ;;  %3174 = vmatprep.subr.bf16.mxu0 %v3173_v12  ;;  %v821_v8 = vld [vmem:[#allocation2 + $0x320] sm:$0xff]  ;;  %v3189_v10 = vpack.c.bf16 %v838_v3, %v822_v2  ;;  %v3205_v11 = vpack.c.bf16 %v840_v5, %v824_v4  ;;  %v823_v12 = vld [vmem:[#allocation2 + $0x330] sm:$0xff]  ;;  %v734_v5 = vld [vmem:[#allocation2 + $0x68] sm:$0xff] }
 0x29d   :  { %v3191_v18 = vpack.c.bf16 %v837_v9, %v821_v8  ;;  %v827_v3 = vld [vmem:[#allocation2 + $0x350] sm:$0xff]  ;;  %v752_v8 = vld [vmem:[#allocation2 + $0xf8] sm:$0xff] }
 0x29e   :  { %v843_v4 = vld [vmem:[#allocation2 + $0x3d0] sm:$0xff] }
 0x29f   :  { %3160 = vmatpush1.bf16.msra.mxu1 %v3159_v13  ;;  %3176 = vmatpush1.bf16.msra.mxu0 %v3175_v16  ;;  %v839_v13 = vld [vmem:[#allocation2 + $0x3b0] sm:$0xff]  ;;  %v732_v16 = vld [vmem:[#allocation2 + $0x58] sm:$0xff] }
 0x2a0   :  { %3178 = vmatprep.subr.bf16.mxu1 %v3177_v20  ;;  %3194 = vmatprep.subr.bf16.mxu0 %v3193_v22  ;;  %v3207_v19 = vpack.c.bf16 %v839_v13, %v823_v12  ;;  %v729_v20 = vld [vmem:[#allocation2 + $0x40] sm:$0xff]  ;;  %v3209_v22 = vpack.c.bf16 %v746_v15, %v730_v14  ;;  %v735_v15 = vld [vmem:[#allocation2 + $0x70] sm:$0xff] }
 0x2a1   :  { %v749_v12 = vld [vmem:[#allocation2 + $0xe0] sm:$0xff] }
 0x365   :  { %v2737_v23 = vpop.f32.mrb[4].mxu1  ;;  %v2772_v24 = vpop.f32.mrb[4].mxu0 }
 0x366   :  { %v2738_v26 = vpop.f32.mrb[5].mxu1  ;;  %v2773_v27 = vpop.f32.mrb[5].mxu0 }
 0x367   :  { %v2739_v50 = vadd.f32 %v2738_v26, %v2737_v23  ;;  %v2774_v30 = vadd.f32 %v2773_v27, %v2772_v24  ;;  %v3225_v23 = vpack.c.bf16 %v748_v17, %v732_v16  ;;  %v731_v24 = vld [vmem:[#allocation2 + $0x50] sm:$0xff]  ;;  %v762_v26 = vld [vmem:[#allocation2 + $0x148] sm:$0xff] }
 0x368   :  { %v778_v27 = vld [vmem:[#allocation2 + $0x1c8] sm:$0xff]  ;;  %v751_v16 = vld [vmem:[#allocation2 + $0xf0] sm:$0xff] }
 0x369   :  { %v648_v34 = vadd.f32 %v2739_v50, %v2691_v25  ;;  %v747_v25 = vld [vmem:[#allocation2 + $0xd0] sm:$0xff]  ;;  %v3211_v50 = vpack.c.bf16 %v745_v21, %v729_v20  ;;  %v3213_v46 = vpack.c.bf16 %v778_v27, %v762_v26  ;;  %v766_v17 = vld [vmem:[#allocation2 + $0x168] sm:$0xff]  ;;  %v784_v20 = vld [vmem:[#allocation2 + $0x1f8] sm:$0xff] }
 0x36a   :  { %v767_v27 = vld [vmem:[#allocation2 + $0x170] sm:$0xff] }
 0x36b   :  { %v4059_v44 = vadd.f32 %v2774_v30, %v648_v34  ;;  %v3227_v30 = vpack.c.bf16 %v747_v25, %v731_v24  ;;  %v794_v34 = vld [vmem:[#allocation2 + $0x248] sm:$0xff]  ;;  %v781_v24 = vld [vmem:[#allocation2 + $0x1e0] sm:$0xff] }
 0x36d   :  { %2692 = vmatmul.mubr.msk.f32.vlgmr.msra.gmra.mrb[6].mxu1 %vm933_vm4, %v4059_v44  ;;  %2693 = vmatmul.mubr.msk.f32.vlgmr.msra.gmra.mrb[6].mxu0 %vm933_vm4, %v4059_v44 }
 0x36e   :  { %3180 = vmatpush1.bf16.msra.mxu1 %v3179_v37  ;;  %3196 = vmatpush1.bf16.msra.mxu0 %v3195_v40  ;;  %v810_v37 = vld [vmem:[#allocation2 + $0x2c8] sm:$0xff]  ;;  %v796_v40 = vld [vmem:[#allocation2 + $0x258] sm:$0xff] }
 0x36f   :  { %3182 = vmatprep.subr.bf16.mxu1 %v3181_v45  ;;  %3198 = vmatprep.subr.bf16.mxu0 %v3197_v47  ;;  %v3231_v45 = vpack.c.bf16 %v779_v33, %v763_v49  ;;  %v793_v47 = vld [vmem:[#allocation2 + $0x240] sm:$0xff]  ;;  %v3217_v51 = vpack.c.bf16 %v810_v37, %v794_v34  ;;  %v3233_v52 = vpack.c.bf16 %v812_v41, %v796_v40  ;;  %v799_v37 = vld [vmem:[#allocation2 + $0x270] sm:$0xff]  ;;  %v830_v41 = vld [vmem:[#allocation2 + $0x368] sm:$0xff] }
 0x370   :  { %1143 = vmatprep.mubr.f32.mxu1 %v3625_v0  ;;  %1214 = vmatprep.mubr.f32.mxu0 %v3625_v0  ;;  %v3219_v60 = vpack.c.bf16 %v809_v48, %v793_v47  ;;  %v813_v49 = vld [vmem:[#allocation2 + $0x2e0] sm:$0xff]  ;;  %v815_v40 = vld [vmem:[#allocation2 + $0x2f0] sm:$0xff]  ;;  %v848_v47 = vld [vmem:[#allocation2 + $0x3f8] sm:$0xff] }
 0x372   :  { %3184 = vmatpush1.bf16.msra.mxu1 %v3183_v57  ;;  %3200 = vmatpush1.bf16.msra.mxu0 %v3199_v58  ;;  %v842_v57 = vld [vmem:[#allocation2 + $0x3c8] sm:$0xff]  ;;  %v828_v58 = vld [vmem:[#allocation2 + $0x358] sm:$0xff] }
 0x373   :  { %3186 = vmatprep.subr.bf16.mxu1 %v3185_v61  ;;  %3202 = vmatprep.subr.bf16.mxu0 %v3201_v62  ;;  %v3235_v61 = vpack.c.bf16 %v811_v54, %v795_v53  ;;  %v825_v62 = vld [vmem:[#allocation2 + $0x340] sm:$0xff]  ;;  %v3221_v1 = vpack.c.bf16 %v842_v57, %v826_v55  ;;  %v3237_v2 = vpack.c.bf16 %v844_v59, %v828_v58  ;;  %v831_v57 = vld [vmem:[#allocation2 + $0x370] sm:$0xff] }
 0x374   :  { %v3223_v9 = vpack.c.bf16 %v841_v63, %v825_v62  ;;  %v845_v55 = vld [vmem:[#allocation2 + $0x3e0] sm:$0xff]  ;;  %v847_v58 = vld [vmem:[#allocation2 + $0x3f0] sm:$0xff] }
 0x375   :  { %v1893_v62 = vld [vmem:[#allocation5 + $0x180] sm:$0xff] }
 0x376   :  { %3188 = vmatpush1.bf16.msra.mxu1 %v3187_v6  ;;  %3204 = vmatpush1.bf16.msra.mxu0 %v3203_v7  ;;  %v750_v6 = vld [vmem:[#allocation2 + $0xe8] sm:$0xff]  ;;  %v736_v7 = vld [vmem:[#allocation2 + $0x78] sm:$0xff] }
 0x377   :  { %3190 = vmatprep.subr.bf16.mxu1 %v3189_v10  ;;  %3206 = vmatprep.subr.bf16.mxu0 %v3205_v11  ;;  %v3239_v10 = vpack.c.bf16 %v843_v4, %v827_v3  ;;  %v733_v11 = vld [vmem:[#allocation2 + $0x60] sm:$0xff]  ;;  %v3241_v13 = vpack.c.bf16 %v750_v6, %v734_v5  ;;  %v3257_v14 = vpack.c.bf16 %v752_v8, %v736_v7 }
 0x378   :  { %v3243_v21 = vpack.c.bf16 %v749_v12, %v733_v11  ;;  %v849_v3 = vld [vmem:[%s4383_s11] sm:$0xff] }
 0x379   :  { %v856_v4 = vrot.slane %v849_v3, %v3806_v36  ;;  %v864_v5 = vrot.slane %v849_v3, %v3812_v38  ;;  %v860_v6 = vrot.slane %v849_v3, %v3815_v39 }
 0x37a   :  { %3192 = vmatpush1.bf16.msra.mxu1 %v3191_v18  ;;  %3208 = vmatpush1.bf16.msra.mxu0 %v3207_v19  ;;  %v782_v18 = vld [vmem:[#allocation2 + $0x1e8] sm:$0xff]  ;;  %v768_v19 = vld [vmem:[#allocation2 + $0x178] sm:$0xff] }
 0x37b   :  { %3210 = vmatprep.subr.bf16.mxu1 %v3209_v22  ;;  %3226 = vmatprep.subr.bf16.mxu0 %v3225_v23  ;;  %v3259_v22 = vpack.c.bf16 %v751_v16, %v735_v15  ;;  %v765_v23 = vld [vmem:[#allocation2 + $0x160] sm:$0xff]  ;;  %v3245_v25 = vpack.c.bf16 %v782_v18, %v766_v17  ;;  %v3261_v26 = vpack.c.bf16 %v784_v20, %v768_v19 }
 0x37c   :  { %v3247_v31 = vpack.c.bf16 %v781_v24, %v765_v23  ;;  %v871_v23 = vsub.s32 4, %v3803_v35 }
 0x37d   :  { %2694 = vmatmul.mubr.msk.f32.vlgmr.msra.gmra.mrb[8].mxu1 %vm933_vm4, %v4059_v44  ;;  %2695 = vmatmul.mubr.msk.f32.vlgmr.msra.gmra.mrb[8].mxu0 %vm933_vm4, %v4059_v44 }
 0x37e   :  { %3212 = vmatpush1.bf16.msra.mxu1 %v3211_v50  ;;  %3228 = vmatpush1.bf16.msra.mxu0 %v3227_v30  ;;  %v814_v50 = vld [vmem:[#allocation2 + $0x2e8] sm:$0xff]  ;;  %v800_v30 = vld [vmem:[#allocation2 + $0x278] sm:$0xff] }
 0x37f   :  { %3214 = vmatprep.subr.bf16.mxu1 %v3213_v46  ;;  %3230 = vmatprep.subr.bf16.mxu0 %v3229_v32  ;;  %v3263_v46 = vpack.c.bf16 %v783_v28, %v767_v27  ;;  %v797_v32 = vld [vmem:[#allocation2 + $0x260] sm:$0xff]  ;;  %v3249_v33 = vpack.c.bf16 %v814_v50, %v798_v29  ;;  %v3265_v34 = vpack.c.bf16 %v816_v56, %v800_v30  ;;  %v883_v28 = vsub.s32 7, %v3803_v35 }
 0x380   :  { %1285 = vmatprep.mubr.f32.mxu1 %v3625_v0  ;;  %1356 = vmatprep.mubr.f32.mxu0 %v3625_v0  ;;  %v3251_v48 = vpack.c.bf16 %v813_v49, %v797_v32  ;;  %v872_v29 = vrot.slane %v849_v3, %v871_v23 }
 0x382   :  { %3216 = vmatpush1.bf16.msra.mxu1 %v3215_v42  ;;  %3232 = vmatpush1.bf16.msra.mxu0 %v3231_v45  ;;  %v846_v42 = vld [vmem:[#allocation2 + $0x3e8] sm:$0xff]  ;;  %v832_v45 = vld [vmem:[#allocation2 + $0x378] sm:$0xff] }
 0x383   :  { %3218 = vmatprep.subr.bf16.mxu1 %v3217_v51  ;;  %3234 = vmatprep.subr.bf16.mxu0 %v3233_v52  ;;  %v3267_v51 = vpack.c.bf16 %v815_v40, %v799_v37  ;;  %v829_v52 = vld [vmem:[#allocation2 + $0x360] sm:$0xff]  ;;  %v3253_v53 = vpack.c.bf16 %v846_v42, %v830_v41  ;;  %v3269_v54 = vpack.c.bf16 %v848_v47, %v832_v45 }
 0x384   :  { %v3255_v59 = vpack.c.bf16 %v845_v55, %v829_v52  ;;  %v1845_v52 = vld [vmem:[#allocation5] sm:$0xff] }
 0x386   :  { %3220 = vmatpush1.bf16.msra.mxu1 %v3219_v60  ;;  %3236 = vmatpush1.bf16.msra.mxu0 %v3235_v61  ;;  %v3271_v60 = vpack.c.bf16 %v847_v58, %v831_v57  ;;  %v1862_v61 = vld [vmem:[#allocation5 + $0x88] sm:$0xff] }
 0x387   :  { %3222 = vmatprep.subr.bf16.mxu1 %v3221_v1  ;;  %3238 = vmatprep.subr.bf16.mxu0 %v3237_v2  ;;  %v1894_v1 = vld [vmem:[#allocation5 + $0x188] sm:$0xff] }
 0x388   :  { %v3305_v2 = vpack.c.bf16 %v1894_v1, %v1893_v62  ;;  %v1878_v57 = vld [vmem:[#allocation5 + $0x108] sm:$0xff]  ;;  %v1864_v62 = vld [vmem:[#allocation5 + $0x98] sm:$0xff] }
 0x389   :  { %v4145_v1 = vld [vmem:[%s4383_s11 + $0x8] sm:$0xff] }
 0x38a   :  { %3224 = vmatpush1.bf16.msra.mxu1 %v3223_v9  ;;  %3240 = vmatpush1.bf16.msra.mxu0 %v3239_v10 }
 0x38b   :  { %3242 = vmatprep.subr.bf16.mxu1 %v3241_v13  ;;  %3258 = vmatprep.subr.bf16.mxu0 %v3257_v14  ;;  %v868_v13 = vrot.slane %v849_v3, %v3821_v43 }
 0x38d   :  { %2696 = vmatmul.mubr.msk.f32.vlgmr.msra.gmra.mrb[10].mxu1 %vm933_vm4, %v4059_v44  ;;  %2697 = vmatmul.mubr.msk.f32.vlgmr.msra.gmra.mrb[10].mxu0 %vm933_vm4, %v4059_v44 }
 0x38e   :  { %3244 = vmatpush1.bf16.msra.mxu1 %v3243_v21  ;;  %3260 = vmatpush1.bf16.msra.mxu0 %v3259_v22 }
 0x38f   :  { %3246 = vmatprep.subr.bf16.mxu1 %v3245_v25  ;;  %3262 = vmatprep.subr.bf16.mxu0 %v3261_v26  ;;  %v879_v25 = vsub.s32 6, %v3803_v35  ;;  %v875_v26 = vsub.s32 5, %v3803_v35  ;;  %v1908_v35 = vld [vmem:[#allocation5 + $0x1f8] sm:$0xff] }
 0x390   :  { %1427 = vmatprep.mubr.f32.mxu1 %v3625_v0  ;;  %1498 = vmatprep.mubr.f32.mxu0 %v3625_v0  ;;  %v1861_v0 = vld [vmem:[#allocation5 + $0x80] sm:$0xff] }
 0x391   :  { %v3273_v63 = vpack.c.bf16 %v1862_v61, %v1861_v0  ;;  %v880_v50 = vrot.slane %v849_v3, %v879_v25  ;;  %v876_v30 = vrot.slane %v849_v3, %v875_v26  ;;  %v1863_v61 = vld [vmem:[#allocation5 + $0x90] sm:$0xff] }
 0x392   :  { %3248 = vmatpush1.bf16.msra.mxu1 %v3247_v31  ;;  %3264 = vmatpush1.bf16.msra.mxu0 %v3263_v46  ;;  %v884_v46 = vrot.slane %v849_v3, %v883_v28  ;;  %v1896_v3 = vld [vmem:[#allocation5 + $0x198] sm:$0xff] }
 0x393   :  { %3250 = vmatprep.subr.bf16.mxu1 %v3249_v33  ;;  %3266 = vmatprep.subr.bf16.mxu0 %v3265_v34 }
 0x396   :  { %3252 = vmatpush1.bf16.msra.mxu1 %v3251_v48  ;;  %3268 = vmatpush1.bf16.msra.mxu0 %v3267_v51 }
 0x397   :  { %3254 = vmatprep.subr.bf16.mxu1 %v3253_v53  ;;  %3270 = vmatprep.subr.bf16.mxu0 %v3269_v54  ;;  %v1846_v53 = vld [vmem:[#allocation5 + $0x8] sm:$0xff]  ;;  %v1877_v54 = vld [vmem:[#allocation5 + $0x100] sm:$0xff] }
 0x398   :  { %v3275_v55 = vpack.c.bf16 %v1846_v53, %v1845_v52  ;;  %v3307_v0 = vpack.c.bf16 %v1878_v57, %v1877_v54  ;;  %v1851_v57 = vld [vmem:[#allocation5 + $0x30] sm:$0xff] }
 0x39a   :  { %3256 = vmatpush1.bf16.msra.mxu1 %v3255_v59  ;;  %3272 = vmatpush1.bf16.msra.mxu0 %v3271_v60 }
 0x39b   :  { %3274 = vmatprep.subr.bf16.mxu1 %v3273_v63  ;;  %3306 = vmatprep.subr.bf16.mxu0 %v3305_v2  ;;  %v1895_v63 = vld [vmem:[#allocation5 + $0x190] sm:$0xff]  ;;  %v3277_v2 = vpack.c.bf16 %v1864_v62, %v1863_v61  ;;  %v1884_v62 = vld [vmem:[#allocation5 + $0x138] sm:$0xff] }
 0x39c   :  { %v1883_v61 = vld [vmem:[#allocation5 + $0x130] sm:$0xff] }
 0x39d   :  { %2698 = vmatmul.mubr.msk.f32.vlgmr.msra.gmra.mrb[12].mxu1 %vm933_vm4, %v4059_v44  ;;  %2699 = vmatmul.mubr.msk.f32.vlgmr.msra.gmra.mrb[12].mxu0 %vm933_vm4, %v4059_v44 }
 0x39e   :  { %3276 = vmatpush3.bf16.msra.mxu1 %v3275_v55  ;;  %3308 = vmatpush3.bf16.msra.mxu0 %v3307_v0  ;;  %v1900_v55 = vld [vmem:[#allocation5 + $0x1b8] sm:$0xff] }
 0x39f   :  { %3278 = vmatprep.subr.bf16.mxu1 %v3277_v2 }
 0x440   :  { %v1003_v7 = vpop.f32.mrb[6].mxu1  ;;  %v1074_v44 = vpop.f32.mrb[6].mxu0 }
 0x441   :  { %v4089_v8 = vadd.f32 %v1003_v7, %v856_v4  ;;  %v1005_v9 = vpop.f32.mrb[7].mxu1  ;;  %v1076_v10 = vpop.f32.mrb[7].mxu0  ;;  %v4091_v11 = vadd.f32 %v1074_v44, %v864_v5  ;;  %v3309_v5 = vpack.c.bf16 %v1896_v3, %v1895_v63  ;;  %v1848_v7 = vld [vmem:[#allocation5 + $0x18] sm:$0xff]  ;;  %v1879_v44 = vld [vmem:[#allocation5 + $0x110] sm:$0xff] }
 0x442   :  { %v4093_v12 = vadd.f32 %v1005_v9, %v860_v6  ;;  %v4104_v18 = vadd.f32 %v1076_v10, %v868_v13  ;;  %v1847_v6 = vld [vmem:[#allocation5 + $0x10] sm:$0xff]  ;;  %v1880_v10 = vld [vmem:[#allocation5 + $0x118] sm:$0xff] }
 0x443   :  { %v1511_v14 = vmul.f32 %v4089_v8, %v4089_v8  ;;  %v1513_v17 = vmul.f32 %v4091_v11, %v4091_v11  ;;  %v3279_v9 = vpack.c.bf16 %v1848_v7, %v1847_v6  ;;  %3310 = vmatprep.subr.bf16.mxu0 %v3309_v5  ;;  %v3311_v13 = vpack.c.bf16 %v1880_v10, %v1879_v44  ;;  %v1869_v5 = vld [vmem:[#allocation5 + $0xc0] sm:$0xff]  ;;  %v1870_v6 = vld [vmem:[#allocation5 + $0xc8] sm:$0xff] }
 0x444   :  { %v1512_v15 = vmul.f32 %v4093_v12, %v4093_v12  ;;  %v1505_v16 = vadd.f32 %v4093_v12, %v4089_v8  ;;  %v1514_v24 = vmul.f32 %v4104_v18, %v4104_v18  ;;  %v1901_v7 = vld [vmem:[#allocation5 + $0x1c0] sm:$0xff] }
 0x445   :  { %3280 = vmatpush3.bf16.msra.mxu1 %v3279_v9  ;;  %3312 = vmatpush3.bf16.msra.mxu0 %v3311_v13  ;;  %v3289_v13 = vpack.c.bf16 %v1870_v6, %v1869_v5  ;;  %v1889_v5 = vld [vmem:[#allocation5 + $0x160] sm:$0xff]  ;;  %v1890_v6 = vld [vmem:[#allocation5 + $0x168] sm:$0xff] }
 0x446   :  { %v1506_v19 = vadd.f32 %v1505_v16, %v4091_v11  ;;  %v1515_v20 = vadd.f32 %v1512_v15, %v1511_v14  ;;  %v888_v14 = vrot.slane %v4145_v1, %v3806_v36  ;;  %v1865_v15 = vld [vmem:[#allocation5 + $0xa0] sm:$0xff]  ;;  %v1866_v16 = vld [vmem:[#allocation5 + $0xa8] sm:$0xff] }
 0x448   :  { %v1507_v21 = vadd.f32 %v1506_v19, %v4104_v18  ;;  %v1516_v22 = vadd.f32 %v1515_v20, %v1513_v17  ;;  %v1897_v17 = vld [vmem:[#allocation5 + $0x1a0] sm:$0xff]  ;;  %v896_v19 = vrot.slane %v4145_v1, %v3812_v38  ;;  %v892_v20 = vrot.slane %v4145_v1, %v3815_v39 }
 0x44a   :  { %1508 = vadd.xlane.f32.xlu1 %v1507_v21  ;;  %v1517_v27 = vadd.f32 %v1516_v22, %v1514_v24  ;;  %v3281_v21 = vpack.c.bf16 %v1866_v16, %v1865_v15  ;;  %v1898_v22 = vld [vmem:[#allocation5 + $0x1a8] sm:$0xff]  ;;  %v1849_v24 = vld [vmem:[#allocation5 + $0x20] sm:$0xff] }
 0x44b   :  { %v1853_v15 = vld [vmem:[#allocation5 + $0x40] sm:$0xff]  ;;  %v1854_v16 = vld [vmem:[#allocation5 + $0x48] sm:$0xff] }
 0x44c   :  { %3282 = vmatprep.subr.bf16.mxu1 %v3281_v21  ;;  %v1886_v21 = vld [vmem:[#allocation5 + $0x148] sm:$0xff] }
 0x44e   :  { %1518 = vadd.xlane.f32.xlu1 %v1517_v27  ;;  %v1850_v27 = vld [vmem:[#allocation5 + $0x28] sm:$0xff] }
 0x450   :  { %v1145_v56 = vpop.f32.mrb[8].mxu1  ;;  %v1216_v31 = vpop.f32.mrb[8].mxu0 }
 0x451   :  { %v4122_v32 = vadd.f32 %v1145_v56, %v872_v29  ;;  %v1147_v49 = vpop.f32.mrb[9].mxu1  ;;  %v1218_v33 = vpop.f32.mrb[9].mxu0  ;;  %v4124_v34 = vadd.f32 %v1216_v31, %v880_v50  ;;  %v3313_v29 = vpack.c.bf16 %v1898_v22, %v1897_v17  ;;  %v3283_v50 = vpack.c.bf16 %v1850_v27, %v1849_v24  ;;  %v1882_v56 = vld [vmem:[#allocation5 + $0x128] sm:$0xff] }
 0x452   :  { %v4126_v37 = vadd.f32 %v1147_v49, %v876_v30  ;;  %v4134_v45 = vadd.f32 %v1218_v33, %v884_v46  ;;  %v1881_v30 = vld [vmem:[#allocation5 + $0x120] sm:$0xff]  ;;  %v900_v49 = vrot.slane %v4145_v1, %v3821_v43 }
 0x453   :  { %v1596_v40 = vmul.f32 %v4122_v32, %v4122_v32  ;;  %v1598_v47 = vmul.f32 %v4124_v34, %v4124_v34  ;;  %v3315_v33 = vpack.c.bf16 %v1882_v56, %v1881_v30  ;;  %3314 = vmatprep.subr.bf16.mxu0 %v3313_v29  ;;  %3284 = vmatpush3.bf16.msra.mxu1 %v3283_v50  ;;  %v1871_v50 = vld [vmem:[#allocation5 + $0xd0] sm:$0xff]  ;;  %v1872_v30 = vld [vmem:[#allocation5 + $0xd8] sm:$0xff] }
 0x454   :  { %v1590_v41 = vadd.f32 %v4126_v37, %v4122_v32  ;;  %v1597_v42 = vmul.f32 %v4126_v37, %v4126_v37  ;;  %v1599_v59 = vmul.f32 %v4134_v45, %v4134_v45  ;;  %v1903_v56 = vld [vmem:[#allocation5 + $0x1d0] sm:$0xff] }
 0x455   :  { %3316 = vmatpush3.bf16.msra.mxu0 %v3315_v33  ;;  %v1855_v33 = vld [vmem:[#allocation5 + $0x50] sm:$0xff] }
 0x456   :  { %v1591_v48 = vadd.f32 %v1590_v41, %v4124_v34  ;;  %v1600_v51 = vadd.f32 %v1597_v42, %v1596_v40 }
 0x458   :  { %v1592_v58 = vadd.f32 %v1591_v48, %v4134_v45  ;;  %v1601_v60 = vadd.f32 %v1600_v51, %v1598_v47  ;;  %v1867_v47 = vld [vmem:[#allocation5 + $0xb0] sm:$0xff]  ;;  %v1868_v48 = vld [vmem:[#allocation5 + $0xb8] sm:$0xff] }
 0x459   :  { %v1899_v51 = vld [vmem:[#allocation5 + $0x1b0] sm:$0xff]  ;;  %v3285_v54 = vpack.c.bf16 %v1868_v48, %v1867_v47 }
 0x45a   :  { %1593 = vadd.xlane.f32.xlu0 %v1592_v58  ;;  %v1602_v4 = vadd.f32 %v1601_v60, %v1599_v59  ;;  %v1852_v58 = vld [vmem:[#allocation5 + $0x38] sm:$0xff]  ;;  %v3317_v60 = vpack.c.bf16 %v1900_v55, %v1899_v51  ;;  %v1887_v48 = vld [vmem:[#allocation5 + $0x150] sm:$0xff]  ;;  %v904_v55 = vrot.slane %v4145_v1, %v871_v23 }
 0x45b   :  { %v3287_v0 = vpack.c.bf16 %v1852_v58, %v1851_v57  ;;  %3286 = vmatprep.subr.bf16.mxu1 %v3285_v54  ;;  %v1888_v51 = vld [vmem:[#allocation5 + $0x158] sm:$0xff]  ;;  %v1873_v57 = vld [vmem:[#allocation5 + $0xe0] sm:$0xff]  ;;  %v1874_v58 = vld [vmem:[#allocation5 + $0xe8] sm:$0xff] }
 0x45c   :  { %1603 = vadd.xlane.f32.xlu1 %v1602_v4  ;;  %v3319_v4 = vpack.c.bf16 %v1884_v62, %v1883_v61  ;;  %3318 = vmatprep.subr.bf16.mxu0 %v3317_v60  ;;  %v3327_v54 = vpack.c.bf16 %v1888_v51, %v1887_v48  ;;  %v912_v60 = vrot.slane %v4145_v1, %v879_v25  ;;  %v1906_v62 = vld [vmem:[#allocation5 + $0x1e8] sm:$0xff] }
 0x45d   :  { %3288 = vmatpush3.bf16.msra.mxu1 %v3287_v0  ;;  %v908_v0 = vrot.slane %v4145_v1, %v875_v26  ;;  %v3297_v61 = vpack.c.bf16 %v1874_v58, %v1873_v57  ;;  %v3331_v25 = vpack.c.bf16 %v1890_v6, %v1889_v5  ;;  %v1958_v51 = vld [vmem:[#allocation5 + $0x388] sm:$0xff] }
 0x45e   :  { %3320 = vmatpush3.bf16.msra.mxu0 %v3319_v4  ;;  %3290 = vmatprep.subr.bf16.mxu1 %v3289_v13 }
 0x460   :  { %v1287_v31 = vpop.f32.mrb[10].mxu1  ;;  %v1358_v46 = vpop.f32.mrb[10].mxu0 }
 0x461   :  { %v4155_v40 = vadd.f32 %v1287_v31, %v888_v14  ;;  %v1289_v41 = vpop.f32.mrb[11].mxu1  ;;  %v1360_v42 = vpop.f32.mrb[11].mxu0  ;;  %v4157_v52 = vadd.f32 %v1358_v46, %v896_v19  ;;  %v1902_v14 = vld [vmem:[#allocation5 + $0x1c8] sm:$0xff]  ;;  %v3291_v19 = vpack.c.bf16 %v1854_v16, %v1853_v15  ;;  %v3293_v46 = vpack.c.bf16 %v1872_v30, %v1871_v50  ;;  %v1876_v15 = vld [vmem:[#allocation5 + $0xf8] sm:$0xff]  ;;  %v1907_v16 = vld [vmem:[#allocation5 + $0x1f0] sm:$0xff] }
 0x462   :  { %v4159_v53 = vadd.f32 %v1289_v41, %v892_v20  ;;  %v4167_v3 = vadd.f32 %v1360_v42, %v900_v49  ;;  %v3321_v17 = vpack.c.bf16 %v1902_v14, %v1901_v7  ;;  %v1885_v20 = vld [vmem:[#allocation5 + $0x140] sm:$0xff]  ;;  %v1904_v49 = vld [vmem:[#allocation5 + $0x1d8] sm:$0xff]  ;;  %v1875_v14 = vld [vmem:[#allocation5 + $0xf0] sm:$0xff] }
 0x463   :  { %v1681_v59 = vmul.f32 %v4155_v40, %v4155_v40  ;;  %v1683_v44 = vmul.f32 %v4157_v52, %v4157_v52  ;;  %v3323_v29 = vpack.c.bf16 %v1886_v21, %v1885_v20  ;;  %3292 = vmatpush3.bf16.msra.mxu1 %v3291_v19  ;;  %v1856_v41 = vld [vmem:[#allocation5 + $0x58] sm:$0xff]  ;;  %v3325_v42 = vpack.c.bf16 %v1904_v49, %v1903_v56  ;;  %v1859_v21 = vld [vmem:[#allocation5 + $0x70] sm:$0xff]  ;;  %v1926_v49 = vld [vmem:[#allocation5 + $0x288] sm:$0xff] }
 0x464   :  { %v1675_v63 = vadd.f32 %v4159_v53, %v4155_v40  ;;  %v1682_v2 = vmul.f32 %v4159_v53, %v4159_v53  ;;  %v1684_v24 = vmul.f32 %v4167_v3, %v4167_v3  ;;  %3322 = vmatprep.subr.bf16.mxu0 %v3321_v17  ;;  %v3295_v47 = vpack.c.bf16 %v1856_v41, %v1855_v33  ;;  %v1957_v33 = vld [vmem:[#allocation5 + $0x380] sm:$0xff] }
 0x465   :  { %3324 = vmatpush3.bf16.msra.mxu0 %v3323_v29  ;;  %3294 = vmatprep.subr.bf16.mxu1 %v3293_v46  ;;  %v3301_v20 = vpack.c.bf16 %v1876_v15, %v1875_v14  ;;  %v1892_v29 = vld [vmem:[#allocation5 + $0x178] sm:$0xff]  ;;  %v1925_v46 = vld [vmem:[#allocation5 + $0x280] sm:$0xff] }
 0x466   :  { %v1676_v9 = vadd.f32 %v1675_v63, %v4157_v52  ;;  %v1685_v10 = vadd.f32 %v1682_v2, %v1681_v59  ;;  %3326 = vmatprep.subr.bf16.mxu0 %v3325_v42  ;;  %v1905_v59 = vld [vmem:[#allocation5 + $0x1e0] sm:$0xff]  ;;  %v1858_v2 = vld [vmem:[#allocation5 + $0x68] sm:$0xff]  ;;  %v3337_v48 = vpack.c.bf16 %v1926_v49, %v1925_v46 }
 0x467   :  { %3296 = vmatpush3.bf16.msra.mxu1 %v3295_v47  ;;  %v1857_v63 = vld [vmem:[#allocation5 + $0x60] sm:$0xff]  ;;  %v3329_v4 = vpack.c.bf16 %v1906_v62, %v1905_v59 }
 0x468   :  { %v1677_v22 = vadd.f32 %v1676_v9, %v4167_v3  ;;  %v1686_v27 = vadd.f32 %v1685_v10, %v1683_v44  ;;  %v3299_v23 = vpack.c.bf16 %v1858_v2, %v1857_v63  ;;  %v916_v9 = vrot.slane %v4145_v1, %v883_v28  ;;  %3298 = vmatprep.subr.bf16.mxu1 %v3297_v61  ;;  %v1860_v28 = vld [vmem:[#allocation5 + $0x78] sm:$0xff] }
 0x469   :  { %3328 = vmatpush3.bf16.msra.mxu0 %v3327_v54  ;;  %v3369_v54 = vpack.c.bf16 %v1958_v51, %v1957_v33 }
 0x46a   :  { %1678 = vadd.xlane.f32.xlu0 %v1677_v22  ;;  %v1687_v31 = vadd.f32 %v1686_v27, %v1684_v24  ;;  %3330 = vmatprep.subr.bf16.mxu0 %v3329_v4  ;;  %v3333_v22 = vpack.c.bf16 %v1908_v35, %v1907_v16  ;;  %v3303_v24 = vpack.c.bf16 %v1860_v28, %v1859_v21  ;;  %v1891_v27 = vld [vmem:[#allocation5 + $0x170] sm:$0xff] }
 0x46b   :  { %3300 = vmatpush3.bf16.msra.mxu1 %v3299_v23 }
 0x46c   :  { %1688 = vadd.xlane.f32.xlu1 %v1687_v31  ;;  %3302 = vmatprep.subr.bf16.mxu1 %v3301_v20  ;;  %v3335_v31 = vpack.c.bf16 %v1892_v29, %v1891_v27 }
 0x46d   :  { %3332 = vmatpush3.bf16.msra.mxu0 %v3331_v25 }
 0x46e   :  { %3334 = vmatprep.subr.bf16.mxu0 %v3333_v22 }
 0x46f   :  { %3304 = vmatpush3.bf16.msra.mxu1 %v3303_v24 }
 0x470   :  { %v1429_v7 = vpop.f32.mrb[12].mxu1  ;;  %v1500_v44 = vpop.f32.mrb[12].mxu0  ;;  %3338 = vmatprep.subr.bf16.mxu1 %v3337_v48 }
 0x471   :  { %v4187_v10 = vadd.f32 %v1429_v7, %v904_v55  ;;  %v1431_v26 = vpop.f32.mrb[13].mxu1  ;;  %v1502_v13 = vpop.f32.mrb[13].mxu0  ;;  %v4189_v17 = vadd.f32 %v1500_v44, %v912_v60  ;;  %3336 = vmatpush3.bf16.msra.mxu0 %v3335_v31  ;;  %v1530_v7 = vld [vmem:[%s4384_s12] sm:$0xf] }
 0x472   :  { %v4191_v19 = vadd.f32 %v1431_v26, %v908_v0  ;;  %v4199_v56 = vadd.f32 %v1502_v13, %v916_v9  ;;  %3370 = vmatprep.subr.bf16.mxu0 %v3369_v54  ;;  %v1560_v9 = vld [vmem:[%s4385_s13] sm:$0xf]  ;;  %v1539_v13 = vrot.slane %v1530_v7, %v3815_v39  ;;  %v1547_v14 = vrot.slane %v1530_v7, %v3821_v43  ;;  %v1910_v54 = vld [vmem:[#allocation5 + $0x208] sm:$0xff] }
 0x473   :  { %v1766_v1 = vmul.f32 %v4187_v10, %v4187_v10  ;;  %v1768_v41 = vmul.f32 %v4189_v17, %v4189_v17  ;;  %v1535_v15 = vrot.slane %v1530_v7, %v3806_v36  ;;  %v1543_v16 = vrot.slane %v1530_v7, %v3812_v38 }
 0x474   :  { %v1760_v50 = vadd.f32 %v4191_v19, %v4187_v10  ;;  %v1767_v30 = vmul.f32 %v4191_v19, %v4191_v19  ;;  %v1769_v57 = vmul.f32 %v4199_v56, %v4199_v56  ;;  %v1569_v35 = vrot.slane %v1560_v9, %v3815_v39 }
 0x475   :  { %v1577_v28 = vrot.slane %v1560_v9, %v3821_v43  ;;  %v1573_v22 = vrot.slane %v1560_v9, %v3812_v38 }
 0x476   :  { %v1761_v42 = vadd.f32 %v1760_v50, %v4189_v17  ;;  %v1770_v47 = vadd.f32 %v1767_v30, %v1766_v1  ;;  %v1565_v1 = vrot.slane %v1560_v9, %v3806_v36  ;;  %v1943_v9 = vld [vmem:[#allocation5 + $0x310] sm:$0xff] }
 0x478   :  { %v1762_v55 = vadd.f32 %v1761_v42, %v4199_v56  ;;  %v1771_v58 = vadd.f32 %v1770_v47, %v1768_v41 }
 0x47a   :  { %1763 = vadd.xlane.f32.xlu0 %v1762_v55  ;;  %v1772_v59 = vadd.f32 %v1771_v58, %v1769_v57  ;;  %v1941_v55 = vld [vmem:[#allocation5 + $0x300] sm:$0xff]  ;;  %v1942_v57 = vld [vmem:[#allocation5 + $0x308] sm:$0xff]  ;;  %v1927_v58 = vld [vmem:[#allocation5 + $0x290] sm:$0xff] }
 0x47c   :  { %1773 = vadd.xlane.f32.xlu1 %v1772_v59 }
 0x4d7   :  { %v1509_v60 = vpop.xlane.xlu1 %1508 }
 0x4d8   :  { %v1510_v0 = vmul.f32 0.001953125, %v1509_v60 }
 0x4da   :  { %v1521_v62 = vmul.f32 %v1510_v0, %v1510_v0  ;;  %v1525_v21 = vsub.f32 %v4093_v12, %v1510_v0  ;;  %v1527_v29 = vsub.f32 %v4104_v18, %v1510_v0  ;;  %v1524_v50 = vsub.f32 %v4089_v8, %v1510_v0  ;;  %v1909_v12 = vld [vmem:[#allocation5 + $0x200] sm:$0xff] }
 0x4db   :  { %v1519_v61 = vpop.xlane.xlu1 %1518  ;;  %v1526_v30 = vsub.f32 %v4091_v11, %v1510_v0  ;;  %v1928_v11 = vld [vmem:[#allocation5 + $0x298] sm:$0xff]  ;;  %v1959_v0 = vld [vmem:[#allocation5 + $0x390] sm:$0xff] }
 0x4dc   :  { %v1520_v63 = vmul.f32 0.001953125, %v1519_v61  ;;  %v1960_v61 = vld [vmem:[#allocation5 + $0x398] sm:$0xff] }
 0x4de   :  { %v1522_v2 = vsub.f32 %v1520_v63, %v1521_v62  ;;  %v3339_v62 = vpack.c.bf16 %v1910_v54, %v1909_v12  ;;  %v3371_v63 = vpack.c.bf16 %v1942_v57, %v1941_v55  ;;  %v1932_v54 = vld [vmem:[#allocation5 + $0x2b8] sm:$0xff]  ;;  %v1963_v55 = vld [vmem:[#allocation5 + $0x3b0] sm:$0xff] }
 0x4df   :  { %v1964_v57 = vld [vmem:[#allocation5 + $0x3b8] sm:$0xff] }
 0x4e0   :  { %v1523_v4 = vmax.f32 %v1522_v2, 0.0  ;;  %v1911_v2 = vld [vmem:[#allocation5 + $0x210] sm:$0xff] }
 0x4e2   :  { %v1528_v23 = vadd.f32 1e-05, %v1523_v4  ;;  %v1912_v4 = vld [vmem:[#allocation5 + $0x218] sm:$0xff] }
 0x4e4   :  { %3540 = vrsqrt.f32 %v1528_v23 }
 0x4e7   :  { %v1594_v5 = vpop.xlane.xlu0 %1593 }
 0x4e8   :  { %v4207_v6 = vmul.f32 0.001953125, %v1594_v5 }
 0x4e9   :  { %v1604_v44 = vpop.xlane.xlu1 %1603 }
 0x4ea   :  { %v1606_v25 = vmul.f32 %v4207_v6, %v4207_v6  ;;  %v1605_v26 = vmul.f32 0.001953125, %v1604_v44 }
 0x4ec   :  { %v1607_v20 = vsub.f32 %v1605_v26, %v1606_v25  ;;  %v1944_v25 = vld [vmem:[#allocation5 + $0x318] sm:$0xff]  ;;  %v3341_v26 = vpack.c.bf16 %v1928_v11, %v1927_v58 }
 0x4ee   :  { %v3541_v24 = vpop.eup %3540  ;;  %v1608_v27 = vmax.f32 %v1607_v20, 0.0 }
 0x4ef   :  { %v1553_v31 = vmul.f32 %v3541_v24, %v1539_v13  ;;  %v1555_v46 = vmul.f32 %v3541_v24, %v1547_v14  ;;  %v1552_v49 = vmul.f32 %v3541_v24, %v1535_v15  ;;  %v1554_v33 = vmul.f32 %v3541_v24, %v1543_v16  ;;  %v1929_v14 = vld [vmem:[#allocation5 + $0x2a0] sm:$0xff]  ;;  %v1930_v15 = vld [vmem:[#allocation5 + $0x2a8] sm:$0xff] }
 0x4f0   :  { %v1613_v41 = vadd.f32 1e-05, %v1608_v27  ;;  %v3373_v13 = vpack.c.bf16 %v1960_v61, %v1959_v0  ;;  %v4232_v16 = vld [vmem:[%s4384_s12 + $0x4] sm:$0xf]  ;;  %v1914_v24 = vld [vmem:[#allocation5 + $0x228] sm:$0xff]  ;;  %v3345_v12 = vpack.c.bf16 %v1930_v15, %v1929_v14  ;;  %v1612_v0 = vsub.f32 %v4134_v45, %v4207_v6 }
 0x4f1   :  { %v1557_v42 = vmul.f32 %v1553_v31, %v1525_v21  ;;  %v1559_v47 = vmul.f32 %v1555_v46, %v1527_v29  ;;  %v1556_v48 = vmul.f32 %v1552_v49, %v1524_v50  ;;  %v1558_v51 = vmul.f32 %v1554_v33, %v1526_v30  ;;  %v1962_v21 = vld [vmem:[#allocation5 + $0x3a8] sm:$0xff]  ;;  %v1945_v27 = vld [vmem:[#allocation5 + $0x320] sm:$0xff] }
 0x4f2   :  { %3542 = vrsqrt.f32 %v1613_v41  ;;  %v1946_v29 = vld [vmem:[#allocation5 + $0x328] sm:$0xff]  ;;  %v3375_v30 = vpack.c.bf16 %v1944_v25, %v1943_v9  ;;  %v1624_v31 = vrot.slane %v4232_v16, %v3815_v39  ;;  %v4241_v46 = vld [vmem:[%s4385_s13 + $0x4] sm:$0xf]  ;;  %v1632_v49 = vrot.slane %v4232_v16, %v3821_v43 }
 0x4f3   :  { %v1583_v18 = vadd.f32 %v1569_v35, %v1557_v42  ;;  %v1585_v59 = vadd.f32 %v1577_v28, %v1559_v47  ;;  %v1582_v8 = vadd.f32 %v1565_v1, %v1556_v48  ;;  %v1584_v60 = vadd.f32 %v1573_v22, %v1558_v51  ;;  %v1961_v35 = vld [vmem:[#allocation5 + $0x3a0] sm:$0xff]  ;;  %v1931_v47 = vld [vmem:[#allocation5 + $0x2b0] sm:$0xff]  ;;  %v1966_v14 = vld [vmem:[#allocation5 + $0x3c8] sm:$0xff] }
 0x4f4   :  { %v1913_v28 = vld [vmem:[#allocation5 + $0x220] sm:$0xff]  ;;  %v3343_v22 = vpack.c.bf16 %v1912_v4, %v1911_v2  ;;  %v3377_v42 = vpack.c.bf16 %v1962_v21, %v1961_v35  ;;  %v3379_v51 = vpack.c.bf16 %v1946_v29, %v1945_v27  ;;  %v1915_v2 = vld [vmem:[#allocation5 + $0x230] sm:$0xff]  ;;  %v1916_v4 = vld [vmem:[#allocation5 + $0x238] sm:$0xff] }
 0x4f5   :  { %v1587_v23 = vmax.f32 %v1583_v18, 0.0  ;;  %v1589_v5 = vmax.f32 %v1585_v59, 0.0  ;;  %v1586_v7 = vmax.f32 %v1582_v8, 0.0  ;;  %v1588_v44 = vmax.f32 %v1584_v60, 0.0  ;;  %v1933_v9 = vld [vmem:[#allocation5 + $0x2c0] sm:$0xff] }
 0x4f6   :  { %v3347_v48 = vpack.c.bf16 %v1914_v24, %v1913_v28  ;;  %v1610_v59 = vsub.f32 %v4126_v37, %v4207_v6  ;;  %v1654_v8 = vrot.slane %v4241_v46, %v3815_v39  ;;  %v1662_v60 = vrot.slane %v4241_v46, %v3821_v43  ;;  %v1917_v21 = vld [vmem:[#allocation5 + $0x240] sm:$0xff]  ;;  %v1918_v28 = vld [vmem:[#allocation5 + $0x248] sm:$0xff] }
 0x4f7   :  { %v1679_v20 = vpop.xlane.xlu0 %1678  ;;  %2172 = vmatprep.mubr.f32.mxu1 %v1587_v23  ;;  %2242 = vmatprep.mubr.f32.mxu0 %v1589_v5  ;;  %v3381_v37 = vpack.c.bf16 %v1964_v57, %v1963_v55  ;;  %v1947_v5 = vld [vmem:[#allocation5 + $0x330] sm:$0xff]  ;;  %v3351_v45 = vpack.c.bf16 %v1916_v4, %v1915_v2  ;;  %v1620_v55 = vrot.slane %v4232_v16, %v3806_v36  ;;  %v4264_v57 = vld [vmem:[%s4384_s12 + $0x8] sm:$0xf]  ;;  %v1953_v4 = vld [vmem:[#allocation5 + $0x360] sm:$0xff] }
 0x4f8   :  { %v4234_v1 = vmul.f32 0.001953125, %v1679_v20  ;;  %2173 = vmatmul.mubr.f32.vlgmr.msra.gmra.mrb[14].mxu1 %v1586_v7  ;;  %2243 = vmatmul.mubr.f32.vlgmr.msra.gmra.mrb[14].mxu0 %v1588_v44  ;;  %v1948_v7 = vld [vmem:[#allocation5 + $0x338] sm:$0xff]  ;;  %v1922_v2 = vld [vmem:[#allocation5 + $0x268] sm:$0xff] }
 0x4f9   :  { %3340 = vmatpush3.bf16.msra.mxu1 %v3339_v62  ;;  %3372 = vmatpush3.bf16.msra.mxu0 %v3371_v63  ;;  %v1689_v50 = vpop.xlane.xlu1 %1688  ;;  %v3349_v63 = vpack.c.bf16 %v1932_v54, %v1931_v47  ;;  %v3383_v35 = vpack.c.bf16 %v1948_v7, %v1947_v5  ;;  %v1951_v54 = vld [vmem:[#allocation5 + $0x350] sm:$0xff]  ;;  %v1709_v5 = vrot.slane %v4264_v57, %v3815_v39 }
 0x4fa   :  { %v1691_v33 = vmul.f32 %v4234_v1, %v4234_v1  ;;  %v1690_v41 = vmul.f32 0.001953125, %v1689_v50  ;;  %3342 = vmatprep.subr.bf16.mxu1 %v3341_v26  ;;  %3374 = vmatprep.subr.bf16.mxu0 %v3373_v13  ;;  %v1934_v26 = vld [vmem:[#allocation5 + $0x2c8] sm:$0xff]  ;;  %v1965_v13 = vld [vmem:[#allocation5 + $0x3c0] sm:$0xff]  ;;  %v1717_v7 = vrot.slane %v4264_v57, %v3821_v43 }
 0x4fb   :  { %v3353_v29 = vpack.c.bf16 %v1934_v26, %v1933_v9  ;;  %v3385_v50 = vpack.c.bf16 %v1966_v14, %v1965_v13 }
 0x4fc   :  { %v4247_v58 = vpop.eup %3542  ;;  %v1692_v18 = vsub.f32 %v1690_v41, %v1691_v33  ;;  %v1967_v33 = vld [vmem:[#allocation5 + $0x3d0] sm:$0xff]  ;;  %v1968_v41 = vld [vmem:[#allocation5 + $0x3d8] sm:$0xff] }
 0x4fd   :  { %3344 = vmatpush3.bf16.msra.mxu1 %v3343_v22  ;;  %3376 = vmatpush3.bf16.msra.mxu0 %v3375_v30  ;;  %v1638_v11 = vmul.f32 %v4247_v58, %v1624_v31  ;;  %v1640_v61 = vmul.f32 %v4247_v58, %v1632_v49  ;;  %v1949_v22 = vld [vmem:[#allocation5 + $0x340] sm:$0xff]  ;;  %v1950_v30 = vld [vmem:[#allocation5 + $0x348] sm:$0xff]  ;;  %v1935_v31 = vld [vmem:[#allocation5 + $0x2d0] sm:$0xff]  ;;  %v1637_v26 = vmul.f32 %v4247_v58, %v1620_v55 }
 0x4fe   :  { %v1693_v62 = vmax.f32 %v1692_v18, 0.0  ;;  %3346 = vmatprep.subr.bf16.mxu1 %v3345_v12  ;;  %3378 = vmatprep.subr.bf16.mxu0 %v3377_v42  ;;  %v1936_v49 = vld [vmem:[#allocation5 + $0x2d8] sm:$0xff]  ;;  %v3355_v12 = vpack.c.bf16 %v1918_v28, %v1917_v21  ;;  %v1919_v42 = vld [vmem:[#allocation5 + $0x250] sm:$0xff]  ;;  %v3387_v47 = vpack.c.bf16 %v1950_v30, %v1949_v22  ;;  %v3389_v18 = vpack.c.bf16 %v1968_v41, %v1967_v33 }
 0x4ff   :  { %v1642_v23 = vmul.f32 %v1638_v11, %v1610_v59  ;;  %v1644_v44 = vmul.f32 %v1640_v61, %v1612_v0  ;;  %v1952_v59 = vld [vmem:[#allocation5 + $0x358] sm:$0xff]  ;;  %v1628_v11 = vrot.slane %v4232_v16, %v3812_v38  ;;  %v1969_v61 = vld [vmem:[#allocation5 + $0x3e0] sm:$0xff]  ;;  %v1939_v16 = vld [vmem:[#allocation5 + $0x2f0] sm:$0xff]  ;;  %v1611_v30 = vsub.f32 %v4124_v34, %v4207_v6 }
 0x500   :  { %v1698_v25 = vadd.f32 1e-05, %v1693_v62  ;;  %v1970_v62 = vld [vmem:[#allocation5 + $0x3e8] sm:$0xff]  ;;  %v1923_v33 = vld [vmem:[#allocation5 + $0x270] sm:$0xff]  ;;  %v1924_v41 = vld [vmem:[#allocation5 + $0x278] sm:$0xff]  ;;  %v1697_v55 = vsub.f32 %v4167_v3, %v4234_v1 }
 0x501   :  { %3348 = vmatpush3.bf16.msra.mxu1 %v3347_v48  ;;  %3380 = vmatpush3.bf16.msra.mxu0 %v3379_v51  ;;  %v1668_v15 = vadd.f32 %v1654_v8, %v1642_v23  ;;  %v1670_v20 = vadd.f32 %v1662_v60, %v1644_v44  ;;  %v3357_v48 = vpack.c.bf16 %v1936_v49, %v1935_v31  ;;  %v1920_v51 = vld [vmem:[#allocation5 + $0x258] sm:$0xff]  ;;  %v1937_v8 = vld [vmem:[#allocation5 + $0x2e0] sm:$0xff]  ;;  %v1938_v60 = vld [vmem:[#allocation5 + $0x2e8] sm:$0xff] }
 0x502   :  { %3544 = vrsqrt.f32 %v1698_v25  ;;  %3350 = vmatprep.subr.bf16.mxu1 %v3349_v63  ;;  %3382 = vmatprep.subr.bf16.mxu0 %v3381_v37  ;;  %v1921_v63 = vld [vmem:[#allocation5 + $0x260] sm:$0xff]  ;;  %v3359_v37 = vpack.c.bf16 %v1920_v51, %v1919_v42  ;;  %v1954_v23 = vld [vmem:[#allocation5 + $0x368] sm:$0xff]  ;;  %v3391_v44 = vpack.c.bf16 %v1952_v59, %v1951_v54  ;;  %v3361_v9 = vpack.c.bf16 %v1938_v60, %v1937_v8  ;;  %v1940_v25 = vld [vmem:[#allocation5 + $0x2f8] sm:$0xff] }
 0x503   :  { %v1672_v24 = vmax.f32 %v1668_v15, 0.0  ;;  %v1674_v27 = vmax.f32 %v1670_v20, 0.0  ;;  %v3393_v14 = vpack.c.bf16 %v1970_v62, %v1969_v61  ;;  %v1972_v15 = vld [vmem:[#allocation5 + $0x3f8] sm:$0xff]  ;;  %v1650_v20 = vrot.slane %v4241_v46, %v3806_v36  ;;  %v1989_v51 = vld [vmem:[#allocation5 + $0x480] sm:$0xff]  ;;  %v1990_v54 = vld [vmem:[#allocation5 + $0x488] sm:$0xff] }
 0x504   :  { %v3363_v22 = vpack.c.bf16 %v1922_v2, %v1921_v63  ;;  %v1695_v42 = vsub.f32 %v4159_v53, %v4234_v1  ;;  %v2022_v59 = vld [vmem:[#allocation5 + $0x588] sm:$0xff]  ;;  %v3367_v53 = vpack.c.bf16 %v1924_v41, %v1923_v33  ;;  %v3401_v63 = vpack.c.bf16 %v1990_v54, %v1989_v51  ;;  %v2025_v33 = vld [vmem:[#allocation5 + $0x5a0] sm:$0xff] }
 0x505   :  { %3352 = vmatpush3.bf16.msra.mxu1 %v3351_v45  ;;  %2312 = vmatprep.mubr.f32.mxu1 %v1672_v24  ;;  %v1971_v45 = vld [vmem:[#allocation5 + $0x3f0] sm:$0xff]  ;;  %v3395_v24 = vpack.c.bf16 %v1954_v23, %v1953_v4  ;;  %v1974_v2 = vld [vmem:[#allocation5 + $0x408] sm:$0xff] }
 0x506   :  { %3384 = vmatpush3.bf16.msra.mxu0 %v3383_v35  ;;  %2382 = vmatprep.mubr.f32.mxu0 %v1674_v27  ;;  %v1639_v35 = vmul.f32 %v4247_v58, %v1628_v11  ;;  %v1609_v27 = vsub.f32 %v4122_v32, %v4207_v6  ;;  %v4290_v58 = vld [vmem:[%s4385_s13 + $0x8] sm:$0xf]  ;;  %v3397_v32 = vpack.c.bf16 %v1972_v15, %v1971_v45  ;;  %v2024_v45 = vld [vmem:[#allocation5 + $0x598] sm:$0xff] }
 0x507   :  { %3354 = vmatprep.subr.bf16.mxu1 %v3353_v29  ;;  %3386 = vmatprep.subr.bf16.mxu0 %v3385_v50  ;;  %v1764_v0 = vpop.xlane.xlu0 %1763  ;;  %v1658_v29 = vrot.slane %v4241_v46, %v3812_v38  ;;  %v3365_v50 = vpack.c.bf16 %v1940_v25, %v1939_v16  ;;  %v1955_v46 = vld [vmem:[#allocation5 + $0x370] sm:$0xff]  ;;  %v1739_v60 = vrot.slane %v4290_v58, %v3815_v39  ;;  %v1992_v16 = vld [vmem:[#allocation5 + $0x498] sm:$0xff]  ;;  %v2026_v41 = vld [vmem:[#allocation5 + $0x5a8] sm:$0xff] }
 0x508   :  { %v4273_v13 = vmul.f32 0.001953125, %v1764_v0  ;;  %v1747_v0 = vrot.slane %v4290_v58, %v3821_v43  ;;  %v3441_v54 = vpack.c.bf16 %v2026_v41, %v2025_v33  ;;  %v2016_v33 = vld [vmem:[#allocation5 + $0x558] sm:$0xff]  ;;  %v2001_v41 = vld [vmem:[#allocation5 + $0x4e0] sm:$0xff] }
 0x509   :  { %3356 = vmatpush3.bf16.msra.mxu1 %v3355_v12  ;;  %v1774_v28 = vpop.xlane.xlu1 %1773  ;;  %v1641_v12 = vmul.f32 %v1637_v26, %v1609_v27 }
 0x50a   :  { %3388 = vmatpush3.bf16.msra.mxu0 %v3387_v47  ;;  %3358 = vmatprep.subr.bf16.mxu1 %v3357_v48  ;;  %v1776_v34 = vmul.f32 %v4273_v13, %v4273_v13  ;;  %v1775_v6 = vmul.f32 0.001953125, %v1774_v28  ;;  %v1956_v47 = vld [vmem:[#allocation5 + $0x378] sm:$0xff]  ;;  %v1643_v48 = vmul.f32 %v1639_v35, %v1611_v30  ;;  %v1975_v35 = vld [vmem:[#allocation5 + $0x410] sm:$0xff]  ;;  %v1993_v30 = vld [vmem:[#allocation5 + $0x4a0] sm:$0xff] }
 0x50b   :  { %3390 = vmatprep.subr.bf16.mxu0 %v3389_v18  ;;  %v2021_v18 = vld [vmem:[#allocation5 + $0x580] sm:$0xff]  ;;  %v3399_v61 = vpack.c.bf16 %v1956_v47, %v1955_v46  ;;  %v1667_v62 = vadd.f32 %v1650_v20, %v1641_v12  ;;  %v1976_v28 = vld [vmem:[#allocation5 + $0x418] sm:$0xff]  ;;  %v1978_v47 = vld [vmem:[#allocation5 + $0x428] sm:$0xff] }
 0x50c   :  { %v4278_v21 = vpop.eup %3544  ;;  %v1777_v3 = vsub.f32 %v1775_v6, %v1776_v34  ;;  %v1669_v4 = vadd.f32 %v1658_v29, %v1643_v48  ;;  %v3433_v23 = vpack.c.bf16 %v2022_v59, %v2021_v18  ;;  %v3407_v12 = vpack.c.bf16 %v1976_v28, %v1975_v35  ;;  %v1977_v6 = vld [vmem:[#allocation5 + $0x420] sm:$0xff]  ;;  %v1995_v18 = vld [vmem:[#allocation5 + $0x4b0] sm:$0xff]  ;;  %v1996_v59 = vld [vmem:[#allocation5 + $0x4b8] sm:$0xff] }
 0x50d   :  { %3360 = vmatpush3.bf16.msra.mxu1 %v3359_v37  ;;  %v1723_v31 = vmul.f32 %v4278_v21, %v1709_v5  ;;  %v1725_v49 = vmul.f32 %v4278_v21, %v1717_v7  ;;  %v1973_v37 = vld [vmem:[#allocation5 + $0x400] sm:$0xff]  ;;  %v2006_v7 = vld [vmem:[#allocation5 + $0x508] sm:$0xff]  ;;  %v1671_v15 = vmax.f32 %v1667_v62, 0.0  ;;  %v1980_v62 = vld [vmem:[#allocation5 + $0x438] sm:$0xff] }
 0x50e   :  { %3392 = vmatpush3.bf16.msra.mxu0 %v3391_v44  ;;  %3362 = vmatprep.subr.bf16.mxu1 %v3361_v9  ;;  %v2005_v5 = vld [vmem:[#allocation5 + $0x500] sm:$0xff]  ;;  %v1991_v9 = vld [vmem:[#allocation5 + $0x490] sm:$0xff]  ;;  %v3403_v25 = vpack.c.bf16 %v1974_v2, %v1973_v37  ;;  %v1673_v27 = vmax.f32 %v1669_v4, 0.0  ;;  %v2012_v2 = vld [vmem:[#allocation5 + $0x538] sm:$0xff] }
 0x50f   :  { %3394 = vmatprep.subr.bf16.mxu0 %v3393_v14  ;;  %v1727_v8 = vmul.f32 %v1723_v31, %v1695_v42  ;;  %v1729_v11 = vmul.f32 %v1725_v49, %v1697_v55  ;;  %v2023_v14 = vld [vmem:[#allocation5 + $0x590] sm:$0xff]  ;;  %v3435_v20 = vpack.c.bf16 %v2006_v7, %v2005_v5  ;;  %v3405_v29 = vpack.c.bf16 %v1992_v16, %v1991_v9  ;;  %v1994_v31 = vld [vmem:[#allocation5 + $0x4a8] sm:$0xff]  ;;  %v2009_v48 = vld [vmem:[#allocation5 + $0x520] sm:$0xff] }
 0x510   :  { %v3409_v34 = vpack.c.bf16 %v1994_v31, %v1993_v30  ;;  %v2010_v55 = vld [vmem:[#allocation5 + $0x528] sm:$0xff]  ;;  %v1981_v16 = vld [vmem:[#allocation5 + $0x440] sm:$0xff]  ;;  %v2031_v35 = vld [vmem:[#allocation5 + $0x5d0] sm:$0xff] }
 0x511   :  { %3364 = vmatpush3.bf16.msra.mxu1 %v3363_v22  ;;  %v1753_v44 = vadd.f32 %v1739_v60, %v1727_v8  ;;  %v1755_v26 = vadd.f32 %v1747_v0, %v1729_v11  ;;  %v2007_v22 = vld [vmem:[#allocation5 + $0x510] sm:$0xff]  ;;  %v2028_v60 = vld [vmem:[#allocation5 + $0x5b8] sm:$0xff]  ;;  %v3443_v11 = vpack.c.bf16 %v2010_v55, %v2009_v48  ;;  %v3413_v0 = vpack.c.bf16 %v1996_v59, %v1995_v18  ;;  %v1998_v4 = vld [vmem:[#allocation5 + $0x4c8] sm:$0xff] }
 0x512   :  { %3396 = vmatpush3.bf16.msra.mxu0 %v3395_v24  ;;  %3366 = vmatprep.subr.bf16.mxu1 %v3365_v50  ;;  %v1778_v24 = vmax.f32 %v1777_v3, 0.0  ;;  %v2008_v50 = vld [vmem:[#allocation5 + $0x518] sm:$0xff]  ;;  %v2027_v8 = vld [vmem:[#allocation5 + $0x5b0] sm:$0xff]  ;;  %v1997_v3 = vld [vmem:[#allocation5 + $0x4c0] sm:$0xff] }
 0x513   :  { %3398 = vmatprep.subr.bf16.mxu0 %v3397_v32  ;;  %v1757_v49 = vmax.f32 %v1753_v44, 0.0  ;;  %v3437_v32 = vpack.c.bf16 %v2024_v45, %v2023_v14  ;;  %v1759_v46 = vmax.f32 %v1755_v26, 0.0  ;;  %v3439_v42 = vpack.c.bf16 %v2008_v50, %v2007_v22  ;;  %v2030_v5 = vld [vmem:[#allocation5 + $0x5c8] sm:$0xff]  ;;  %v2013_v26 = vld [vmem:[#allocation5 + $0x540] sm:$0xff]  ;;  %v2032_v28 = vld [vmem:[#allocation5 + $0x5d8] sm:$0xff] }
 0x514   :  { %v1783_v51 = vadd.f32 1e-05, %v1778_v24  ;;  %v3445_v37 = vpack.c.bf16 %v2028_v60, %v2027_v8  ;;  %v3417_v9 = vpack.c.bf16 %v1998_v4, %v1997_v3  ;;  %v2014_v45 = vld [vmem:[#allocation5 + $0x548] sm:$0xff]  ;;  %v1983_v50 = vld [vmem:[#allocation5 + $0x450] sm:$0xff]  ;;  %v1984_v30 = vld [vmem:[#allocation5 + $0x458] sm:$0xff] }
 0x515   :  { %3368 = vmatpush3.bf16.msra.mxu1 %v3367_v53  ;;  %v3411_v53 = vpack.c.bf16 %v1978_v47, %v1977_v6  ;;  %v4306_v24 = vld [vmem:[%s4384_s12 + $0xc] sm:$0xf]  ;;  %v2015_v31 = vld [vmem:[#allocation5 + $0x550] sm:$0xff]  ;;  %v3423_v48 = vpack.c.bf16 %v1984_v30, %v1983_v50  ;;  %v2017_v8 = vld [vmem:[#allocation5 + $0x560] sm:$0xff] }
 0x516   :  { %3400 = vmatpush3.bf16.msra.mxu0 %v3399_v61  ;;  %3402 = vmatprep.subr.bf16.mxu1 %v3401_v63  ;;  %v1979_v61 = vld [vmem:[#allocation5 + $0x430] sm:$0xff]  ;;  %3546 = vrsqrt.f32 %v1783_v51  ;;  %v1794_v6 = vrot.slane %v4306_v24, %v3815_v39  ;;  %v1985_v51 = vld [vmem:[#allocation5 + $0x460] sm:$0xff]  ;;  %v3455_v55 = vpack.c.bf16 %v2016_v33, %v2015_v31  ;;  %v1986_v59 = vld [vmem:[#allocation5 + $0x468] sm:$0xff] }
 0x517   :  { %3434 = vmatprep.subr.bf16.mxu0 %v3433_v23  ;;  %v2011_v63 = vld [vmem:[#allocation5 + $0x530] sm:$0xff]  ;;  %v2029_v23 = vld [vmem:[#allocation5 + $0x5c0] sm:$0xff]  ;;  %v3415_v7 = vpack.c.bf16 %v1980_v62, %v1979_v61  ;;  %v3427_v4 = vpack.c.bf16 %v1986_v59, %v1985_v51  ;;  %v2038_v33 = vld [vmem:[#allocation5 + $0x608] sm:$0xff] }
 0x518   :  { %2313 = vmatmul.mubr.f32.vlgmr.msra.gmra.mrb[16].mxu1 %v1671_v15  ;;  %v3447_v44 = vpack.c.bf16 %v2012_v2, %v2011_v63  ;;  %v3449_v14 = vpack.c.bf16 %v2030_v5, %v2029_v23  ;;  %v1999_v15 = vld [vmem:[#allocation5 + $0x4d0] sm:$0xff]  ;;  %v2036_v63 = vld [vmem:[#allocation5 + $0x5f8] sm:$0xff]  ;;  %v1735_v2 = vrot.slane %v4290_v58, %v3806_v36  ;;  %v1696_v5 = vsub.f32 %v4157_v52, %v4234_v1 }
 0x519   :  { %2383 = vmatmul.mubr.f32.vlgmr.msra.gmra.mrb[16].mxu0 %v1673_v27  ;;  %3404 = vmatpush3.bf16.msra.mxu1 %v3403_v25  ;;  %v1982_v25 = vld [vmem:[#allocation5 + $0x448] sm:$0xff]  ;;  %v3451_v27 = vpack.c.bf16 %v2014_v45, %v2013_v26  ;;  %v2035_v62 = vld [vmem:[#allocation5 + $0x5f0] sm:$0xff]  ;;  %v1780_v26 = vsub.f32 %v4191_v19, %v4273_v13  ;;  %v2020_v52 = vld [vmem:[#allocation5 + $0x578] sm:$0xff]  ;;  %v1743_v45 = vrot.slane %v4290_v58, %v3812_v38 }
 0x51a   :  { %2452 = vmatprep.mubr.f32.mxu1 %v1757_v49  ;;  %3436 = vmatpush3.bf16.msra.mxu0 %v3435_v20  ;;  %v2000_v20 = vld [vmem:[#allocation5 + $0x4d8] sm:$0xff]  ;;  %v3419_v22 = vpack.c.bf16 %v1982_v25, %v1981_v16  ;;  %v1705_v49 = vrot.slane %v4264_v57, %v3806_v36  ;;  %v2019_v16 = vld [vmem:[#allocation5 + $0x570] sm:$0xff] }
 0x51b   :  { %2522 = vmatprep.mubr.f32.mxu0 %v1759_v46  ;;  %3406 = vmatprep.subr.bf16.mxu1 %v3405_v29  ;;  %v3421_v29 = vpack.c.bf16 %v2000_v20, %v1999_v15  ;;  %v2002_v46 = vld [vmem:[#allocation5 + $0x4e8] sm:$0xff]  ;;  %v2053_v15 = vld [vmem:[#allocation5 + $0x680] sm:$0xff]  ;;  %v3463_v58 = vpack.c.bf16 %v2020_v52, %v2019_v16  ;;  %v2087_v51 = vld [vmem:[#allocation5 + $0x790] sm:$0xff] }
 0x51c   :  { %3438 = vmatprep.subr.bf16.mxu0 %v3437_v32  ;;  %v3453_v32 = vpack.c.bf16 %v2032_v28, %v2031_v35  ;;  %v3425_v18 = vpack.c.bf16 %v2002_v46, %v2001_v41  ;;  %v1722_v60 = vmul.f32 %v4278_v21, %v1705_v49  ;;  %v2054_v20 = vld [vmem:[#allocation5 + $0x688] sm:$0xff]  ;;  %v1782_v35 = vsub.f32 %v4199_v56, %v4273_v13  ;;  %v2085_v28 = vld [vmem:[#allocation5 + $0x780] sm:$0xff]  ;;  %v2040_v59 = vld [vmem:[#allocation5 + $0x618] sm:$0xff] }
 0x51d   :  { %3408 = vmatpush3.bf16.msra.mxu1 %v3407_v12  ;;  %v1713_v12 = vrot.slane %v4264_v57, %v3812_v38  ;;  %v2018_v57 = vld [vmem:[#allocation5 + $0x568] sm:$0xff]  ;;  %v3465_v49 = vpack.c.bf16 %v2054_v20, %v2053_v15  ;;  %v2069_v46 = vld [vmem:[#allocation5 + $0x700] sm:$0xff]  ;;  %v2059_v16 = vld [vmem:[#allocation5 + $0x6b0] sm:$0xff] }
 0x51e   :  { %3440 = vmatpush3.bf16.msra.mxu0 %v3439_v42  ;;  %3410 = vmatprep.subr.bf16.mxu1 %v3409_v34  ;;  %v2033_v42 = vld [vmem:[#allocation5 + $0x5e0] sm:$0xff]  ;;  %v2034_v34 = vld [vmem:[#allocation5 + $0x5e8] sm:$0xff]  ;;  %v3459_v23 = vpack.c.bf16 %v2018_v57, %v2017_v8  ;;  %v2071_v8 = vld [vmem:[#allocation5 + $0x710] sm:$0xff] }
 0x51f   :  { %3442 = vmatprep.subr.bf16.mxu0 %v3441_v54  ;;  %v1802_v54 = vrot.slane %v4306_v24, %v3821_v43  ;;  %v1724_v61 = vmul.f32 %v4278_v21, %v1713_v12  ;;  %v4330_v21 = vld [vmem:[%s4385_s13 + $0xc] sm:$0xf]  ;;  %v2043_v15 = vld [vmem:[#allocation5 + $0x630] sm:$0xff]  ;;  %v2044_v20 = vld [vmem:[#allocation5 + $0x638] sm:$0xff] }
 0x520   :  { %v4314_v47 = vpop.eup %3546  ;;  %v1832_v30 = vrot.slane %v4330_v21, %v3821_v43  ;;  %v2070_v12 = vld [vmem:[#allocation5 + $0x708] sm:$0xff]  ;;  %v2088_v43 = vld [vmem:[#allocation5 + $0x798] sm:$0xff] }
 0x521   :  { %3412 = vmatpush3.bf16.msra.mxu1 %v3411_v53  ;;  %v3457_v53 = vpack.c.bf16 %v2034_v34, %v2033_v42  ;;  %v1808_v3 = vmul.f32 %v4314_v47, %v1794_v6  ;;  %v2056_v34 = vld [vmem:[#allocation5 + $0x698] sm:$0xff] }
 0x522   :  { %3444 = vmatpush3.bf16.msra.mxu0 %v3443_v11  ;;  %3414 = vmatprep.subr.bf16.mxu1 %v3413_v0  ;;  %v2003_v11 = vld [vmem:[#allocation5 + $0x4f0] sm:$0xff]  ;;  %v2004_v0 = vld [vmem:[#allocation5 + $0x4f8] sm:$0xff] }
 0x523   :  { %3446 = vmatprep.subr.bf16.mxu0 %v3445_v37  ;;  %v1694_v37 = vsub.f32 %v4155_v40, %v4234_v1  ;;  %v3429_v40 = vpack.c.bf16 %v2004_v0, %v2003_v11  ;;  %v1728_v1 = vmul.f32 %v1724_v61, %v1696_v5  ;;  %v2057_v11 = vld [vmem:[#allocation5 + $0x6a0] sm:$0xff]  ;;  %v2058_v0 = vld [vmem:[#allocation5 + $0x6a8] sm:$0xff] }
 0x524   :  { %v2041_v5 = vld [vmem:[#allocation5 + $0x620] sm:$0xff] }
 0x525   :  { %3416 = vmatpush3.bf16.msra.mxu1 %v3415_v7  ;;  %v1810_v7 = vmul.f32 %v4314_v47, %v1802_v54  ;;  %v1726_v25 = vmul.f32 %v1722_v60, %v1694_v37  ;;  %v1754_v56 = vadd.f32 %v1743_v45, %v1728_v1  ;;  %v2090_v37 = vld [vmem:[#allocation5 + $0x7a8] sm:$0xff] }
 0x526   :  { %3448 = vmatpush3.bf16.msra.mxu0 %v3447_v44  ;;  %3418 = vmatprep.subr.bf16.mxu1 %v3417_v9  ;;  %v1987_v44 = vld [vmem:[#allocation5 + $0x470] sm:$0xff]  ;;  %v1988_v9 = vld [vmem:[#allocation5 + $0x478] sm:$0xff] }
 0x527   :  { %3450 = vmatprep.subr.bf16.mxu0 %v3449_v14  ;;  %v3461_v14 = vpack.c.bf16 %v2036_v63, %v2035_v62  ;;  %v3431_v19 = vpack.c.bf16 %v1988_v9, %v1987_v44  ;;  %v1814_v50 = vmul.f32 %v1810_v7, %v1782_v35  ;;  %v1752_v31 = vadd.f32 %v1735_v2, %v1726_v25  ;;  %v2089_v63 = vld [vmem:[#allocation5 + $0x7a0] sm:$0xff]  ;;  %v2042_v7 = vld [vmem:[#allocation5 + $0x628] sm:$0xff]  ;;  %v2060_v25 = vld [vmem:[#allocation5 + $0x6b8] sm:$0xff] }
 0x528   :  { %v1758_v57 = vmax.f32 %v1754_v56, 0.0  ;;  %v3501_v62 = vpack.c.bf16 %v2088_v43, %v2087_v51  ;;  %v3505_v44 = vpack.c.bf16 %v2090_v37, %v2089_v63  ;;  %v2074_v9 = vld [vmem:[#allocation5 + $0x728] sm:$0xff]  ;;  %v3475_v52 = vpack.c.bf16 %v2042_v7, %v2041_v5  ;;  %v2075_v35 = vld [vmem:[#allocation5 + $0x730] sm:$0xff]  ;;  %v2048_v43 = vld [vmem:[#allocation5 + $0x658] sm:$0xff] }
 0x529   :  { %3420 = vmatpush3.bf16.msra.mxu1 %v3419_v22  ;;  %v2086_v22 = vld [vmem:[#allocation5 + $0x788] sm:$0xff]  ;;  %v1756_v54 = vmax.f32 %v1752_v31, 0.0  ;;  %v3477_v45 = vpack.c.bf16 %v2060_v25, %v2059_v16  ;;  %v2047_v51 = vld [vmem:[#allocation5 + $0x650] sm:$0xff]  ;;  %v2049_v63 = vld [vmem:[#allocation5 + $0x660] sm:$0xff]  ;;  %v1820_v25 = vrot.slane %v4330_v21, %v3806_v36 }
 0x52a   :  { %3452 = vmatpush3.bf16.msra.mxu0 %v3451_v27  ;;  %3422 = vmatprep.subr.bf16.mxu1 %v3421_v29  ;;  %v1812_v27 = vmul.f32 %v1808_v3, %v1780_v26  ;;  %v1824_v29 = vrot.slane %v4330_v21, %v3815_v39  ;;  %v3497_v41 = vpack.c.bf16 %v2086_v22, %v2085_v28  ;;  %v2055_v39 = vld [vmem:[#allocation5 + $0x690] sm:$0xff]  ;;  %v2076_v22 = vld [vmem:[#allocation5 + $0x738] sm:$0xff]  ;;  %v2050_v37 = vld [vmem:[#allocation5 + $0x668] sm:$0xff] }
 0x52b   :  { %3454 = vmatprep.subr.bf16.mxu0 %v3453_v32  ;;  %v2037_v32 = vld [vmem:[#allocation5 + $0x600] sm:$0xff]  ;;  %v3469_v60 = vpack.c.bf16 %v2056_v34, %v2055_v39  ;;  %v2091_v26 = vld [vmem:[#allocation5 + $0x7b0] sm:$0xff]  ;;  %v2096_v39 = vld [vmem:[#allocation5 + $0x7d8] sm:$0xff]  ;;  %v3491_v16 = vpack.c.bf16 %v2050_v37, %v2049_v63 }
 0x52c   :  { %v1838_v42 = vadd.f32 %v1824_v29, %v1812_v27  ;;  %v3467_v6 = vpack.c.bf16 %v2038_v33, %v2037_v32  ;;  %v2061_v27 = vld [vmem:[#allocation5 + $0x6c0] sm:$0xff]  ;;  %v2062_v29 = vld [vmem:[#allocation5 + $0x6c8] sm:$0xff]  ;;  %v2067_v5 = vld [vmem:[#allocation5 + $0x6f0] sm:$0xff] }
 0x52d   :  { %3424 = vmatpush3.bf16.msra.mxu1 %v3423_v48  ;;  %v1840_v48 = vadd.f32 %v1832_v30, %v1814_v50  ;;  %v2094_v50 = vld [vmem:[#allocation5 + $0x7c8] sm:$0xff]  ;;  %v3479_v30 = vpack.c.bf16 %v2044_v20, %v2043_v15  ;;  %v3481_v31 = vpack.c.bf16 %v2062_v29, %v2061_v27  ;;  %v2077_v33 = vld [vmem:[#allocation5 + $0x740] sm:$0xff]  ;;  %v2068_v7 = vld [vmem:[#allocation5 + $0x6f8] sm:$0xff] }
 0x52e   :  { %3456 = vmatpush3.bf16.msra.mxu0 %v3455_v55  ;;  %3426 = vmatprep.subr.bf16.mxu1 %v3425_v18  ;;  %v3499_v55 = vpack.c.bf16 %v2070_v12, %v2069_v46  ;;  %v2039_v18 = vld [vmem:[#allocation5 + $0x610] sm:$0xff]  ;;  %v1842_v61 = vmax.f32 %v1838_v42, 0.0  ;;  %v2046_v32 = vld [vmem:[#allocation5 + $0x648] sm:$0xff]  ;;  %v2064_v12 = vld [vmem:[#allocation5 + $0x6d8] sm:$0xff] }
 0x52f   :  { %3458 = vmatprep.subr.bf16.mxu0 %v3457_v53  ;;  %v2072_v53 = vld [vmem:[#allocation5 + $0x718] sm:$0xff]  ;;  %v1844_v2 = vmax.f32 %v1840_v48, 0.0  ;;  %v3471_v3 = vpack.c.bf16 %v2040_v59, %v2039_v18  ;;  %v2063_v46 = vld [vmem:[#allocation5 + $0x6d0] sm:$0xff] }
 0x530   :  { %v2095_v42 = vld [vmem:[#allocation5 + $0x7d0] sm:$0xff]  ;;  %v3485_v48 = vpack.c.bf16 %v2064_v12, %v2063_v46  ;;  %v2080_v59 = vld [vmem:[#allocation5 + $0x758] sm:$0xff] }
 0x531   :  { %3428 = vmatpush3.bf16.msra.mxu1 %v3427_v4  ;;  %v3503_v4 = vpack.c.bf16 %v2072_v53, %v2071_v8  ;;  %v3517_v18 = vpack.c.bf16 %v2096_v39, %v2095_v42  ;;  %v2065_v8 = vld [vmem:[#allocation5 + $0x6e0] sm:$0xff]  ;;  %v2083_v20 = vld [vmem:[#allocation5 + $0x770] sm:$0xff] }
 0x532   :  { %3460 = vmatpush3.bf16.msra.mxu0 %v3459_v23  ;;  %3430 = vmatprep.subr.bf16.mxu1 %v3429_v40  ;;  %v3473_v23 = vpack.c.bf16 %v2058_v0, %v2057_v11  ;;  %v2073_v40 = vld [vmem:[#allocation5 + $0x720] sm:$0xff]  ;;  %v2098_v11 = vld [vmem:[#allocation5 + $0x7e8] sm:$0xff]  ;;  %v3487_v0 = vpack.c.bf16 %v2048_v43, %v2047_v51 }
 0x533   :  { %3462 = vmatprep.subr.bf16.mxu0 %v3461_v14  ;;  %v2092_v14 = vld [vmem:[#allocation5 + $0x7b8] sm:$0xff]  ;;  %v3507_v1 = vpack.c.bf16 %v2074_v9, %v2073_v40  ;;  %v2097_v53 = vld [vmem:[#allocation5 + $0x7e0] sm:$0xff]  ;;  %v2099_v40 = vld [vmem:[#allocation5 + $0x7f0] sm:$0xff]  ;;  %v1779_v9 = vsub.f32 %v4187_v10, %v4273_v13 }
 0x534   :  { %v3509_v28 = vpack.c.bf16 %v2092_v14, %v2091_v26  ;;  %v1781_v26 = vsub.f32 %v4189_v17, %v4273_v13 }
 0x535   :  { %3432 = vmatpush3.bf16.msra.mxu1 %v3431_v19  ;;  %v2093_v19 = vld [vmem:[#allocation5 + $0x7c0] sm:$0xff] }
 0x536   :  { %3464 = vmatpush3.bf16.msra.mxu0 %v3463_v58  ;;  %3466 = vmatprep.subr.bf16.mxu1 %v3465_v49  ;;  %v3511_v58 = vpack.c.bf16 %v2076_v22, %v2075_v35  ;;  %v2045_v49 = vld [vmem:[#allocation5 + $0x640] sm:$0xff]  ;;  %v3513_v56 = vpack.c.bf16 %v2094_v50, %v2093_v19  ;;  %v2084_v35 = vld [vmem:[#allocation5 + $0x778] sm:$0xff] }
 0x537   :  { %3498 = vmatprep.subr.bf16.mxu0 %v3497_v41  ;;  %v2078_v41 = vld [vmem:[#allocation5 + $0x748] sm:$0xff]  ;;  %v3483_v34 = vpack.c.bf16 %v2046_v32, %v2045_v49  ;;  %v3527_v17 = vpack.c.bf16 %v2084_v35, %v2083_v20 }
 0x538   :  { %2453 = vmatmul.mubr.f32.vlgmr.msra.gmra.mrb[18].mxu1 %v1756_v54  ;;  %v2079_v54 = vld [vmem:[#allocation5 + $0x750] sm:$0xff] }
 0x539   :  { %2523 = vmatmul.mubr.f32.vlgmr.msra.gmra.mrb[18].mxu0 %v1758_v57  ;;  %3468 = vmatpush3.bf16.msra.mxu1 %v3467_v6  ;;  %v3515_v6 = vpack.c.bf16 %v2078_v41, %v2077_v33  ;;  %v2066_v57 = vld [vmem:[#allocation5 + $0x6e8] sm:$0xff] }
 0x53a   :  { %2592 = vmatprep.mubr.f32.mxu1 %v1842_v61  ;;  %3500 = vmatpush3.bf16.msra.mxu0 %v3499_v55  ;;  %v1790_v55 = vrot.slane %v4306_v24, %v3806_v36  ;;  %v3519_v61 = vpack.c.bf16 %v2080_v59, %v2079_v54 }
 0x53b   :  { %2662 = vmatprep.mubr.f32.mxu0 %v1844_v2  ;;  %3470 = vmatprep.subr.bf16.mxu1 %v3469_v60  ;;  %v1798_v60 = vrot.slane %v4306_v24, %v3812_v38  ;;  %v2081_v2 = vld [vmem:[#allocation5 + $0x760] sm:$0xff] }
 0x53c   :  { %3502 = vmatprep.subr.bf16.mxu0 %v3501_v62  ;;  %v3489_v62 = vpack.c.bf16 %v2066_v57, %v2065_v8 }
 0x53d   :  { %3472 = vmatpush3.bf16.msra.mxu1 %v3471_v3  ;;  %v1807_v3 = vmul.f32 %v4314_v47, %v1790_v55  ;;  %v1809_v24 = vmul.f32 %v4314_v47, %v1798_v60 }
 0x53e   :  { %3504 = vmatpush3.bf16.msra.mxu0 %v3503_v4  ;;  %3474 = vmatprep.subr.bf16.mxu1 %v3473_v23  ;;  %v3521_v4 = vpack.c.bf16 %v2098_v11, %v2097_v53  ;;  %v2082_v23 = vld [vmem:[#allocation5 + $0x768] sm:$0xff] }
 0x53f   :  { %3506 = vmatprep.subr.bf16.mxu0 %v3505_v44  ;;  %v2100_v44 = vld [vmem:[#allocation5 + $0x7f8] sm:$0xff]  ;;  %v3523_v14 = vpack.c.bf16 %v2082_v23, %v2081_v2  ;;  %v1811_v47 = vmul.f32 %v1807_v3, %v1779_v9  ;;  %v1813_v10 = vmul.f32 %v1809_v24, %v1781_v26 }
 0x540   :  { %v3525_v15 = vpack.c.bf16 %v2100_v44, %v2099_v40 }
 0x541   :  { %3476 = vmatpush3.bf16.msra.mxu1 %v3475_v52  ;;  %v3493_v52 = vpack.c.bf16 %v2068_v7, %v2067_v5  ;;  %v1837_v13 = vadd.f32 %v1820_v25, %v1811_v47 }
 0x542   :  { %3508 = vmatpush3.bf16.msra.mxu0 %v3507_v1  ;;  %3478 = vmatprep.subr.bf16.mxu1 %v3477_v45  ;;  %v2051_v1 = vld [vmem:[#allocation5 + $0x670] sm:$0xff]  ;;  %v2052_v45 = vld [vmem:[#allocation5 + $0x678] sm:$0xff] }
 0x543   :  { %3510 = vmatprep.subr.bf16.mxu0 %v3509_v28  ;;  %v1828_v28 = vrot.slane %v4330_v21, %v3812_v38  ;;  %v3495_v36 = vpack.c.bf16 %v2052_v45, %v2051_v1  ;;  %v1841_v27 = vmax.f32 %v1837_v13, 0.0  ;;  %v2700_v38 = vld [vmem:[%s4387_s15] ss:$0 sm:$0xff]  ;;  %s3627_s15 = smov [#allocation7]  }
 0x544   :  { %s2675_s22 = sshll.u32 %s3627_s15, 4  ;;  %s2676_s22 = int_to_ptr.vmem [resolvable:$true] %s2675_s22 }
 0x545   :  { %3480 = vmatpush3.bf16.msra.mxu1 %v3479_v30  ;;  %v1839_v22 = vadd.f32 %v1828_v28, %v1813_v10  ;;  %s3592_s8 = scalar_lea.vmem %s2676_s22, 128  ;;  %p3597_p3 = scmp.lt.s32.totalorder %s2676_s22, %s2676_s22 }
 0x546   :  { %3512 = vmatpush3.bf16.msra.mxu0 %v3511_v58  ;;  %3482 = vmatprep.subr.bf16.mxu1 %v3481_v31  ;;  %p3593_p2 = scmp.ne.s32.totalorder %s2676_s22, %s3592_s8  ;;  %p3598_p4 = scmp.lt.s32.totalorder %s3592_s8, %s3592_s8 }
 0x547   :  { %3514 = vmatprep.subr.bf16.mxu0 %v3513_v56  ;;  %v1843_v29 = vmax.f32 %v1839_v22, 0.0 }
 0x548   :  { %p3599_p5 = por %p3598_p4, %p3597_p3 }
 0x549   :  { %3484 = vmatpush3.bf16.msra.mxu1 %v3483_v34 }
 0x54a   :  { %3516 = vmatpush3.bf16.msra.mxu0 %v3515_v6  ;;  %3486 = vmatprep.subr.bf16.mxu1 %v3485_v48  ;;  %p3600_p6 = pnand %p3599_p5, %p3593_p2 }
 0x54b   :  { %3518 = vmatprep.subr.bf16.mxu0 %v3517_v18 }
 0x54d   :  { %3488 = vmatpush3.bf16.msra.mxu1 %v3487_v0 }
 0x54e   :  { %3520 = vmatpush3.bf16.msra.mxu0 %v3519_v61  ;;  %3490 = vmatprep.subr.bf16.mxu1 %v3489_v62 }
 0x54f   :  { %3522 = vmatprep.subr.bf16.mxu0 %v3521_v4 }
 0x551   :  { %3492 = vmatpush3.bf16.msra.mxu1 %v3491_v16 }
 0x552   :  { %3524 = vmatpush3.bf16.msra.mxu0 %v3523_v14  ;;  %3494 = vmatprep.subr.bf16.mxu1 %v3493_v52 }
 0x553   :  { %3526 = vmatprep.subr.bf16.mxu0 %v3525_v15 }
 0x555   :  { %3496 = vmatpush3.bf16.msra.mxu1 %v3495_v36 }
 0x556   :  { %3528 = vmatpush3.bf16.msra.mxu0 %v3527_v17 }
 0x558   :  { %2593 = vmatmul.mubr.f32.vlgmr.msra.gmra.mrb[20].mxu1 %v1841_v27 }
 0x559   :  { %2663 = vmatmul.mubr.f32.vlgmr.msra.gmra.mrb[20].mxu0 %v1843_v29 }
 0x5cb   :  { %v2807_v19 = vpop.f32.mrb[14].mxu1  ;;  %v2842_v50 = vpop.f32.mrb[14].mxu0 }
 0x5cc   :  { %v2808_v21 = vpop.f32.mrb[15].mxu1  ;;  %v2843_v30 = vpop.f32.mrb[15].mxu0 }
 0x5cd   :  { %v2809_v58 = vadd.f32 %v2808_v21, %v2807_v19  ;;  %v2844_v31 = vadd.f32 %v2843_v30, %v2842_v50 }
 0x5cf   :  { %v2175_v49 = vadd.f32 %v2809_v58, %v2700_v38 }
 0x5d1   :  { %v2245_v32 = vadd.f32 %v2844_v31, %v2175_v49 }
 0x5eb   :  { %v2877_v33 = vpop.f32.mrb[16].mxu1 }
 0x5ec   :  { %v2912_v56 = vpop.f32.mrb[16].mxu0  ;;  %v2878_v41 = vpop.f32.mrb[17].mxu1 }
 0x5ed   :  { %v2879_v46 = vadd.f32 %v2878_v41, %v2877_v33  ;;  %v2913_v12 = vpop.f32.mrb[17].mxu0 }
 0x5ee   :  { %v2914_v42 = vadd.f32 %v2913_v12, %v2912_v56 }
 0x5ef   :  { %v2315_v39 = vadd.f32 %v2879_v46, %v2245_v32 }
 0x5f1   :  { %v2385_v34 = vadd.f32 %v2914_v42, %v2315_v39 }
 0x60b   :  { %v2947_v6 = vpop.f32.mrb[18].mxu1 }
 0x60c   :  { %v2982_v48 = vpop.f32.mrb[18].mxu0  ;;  %v2948_v51 = vpop.f32.mrb[19].mxu1 }
 0x60d   :  { %v2949_v43 = vadd.f32 %v2948_v51, %v2947_v6  ;;  %v2983_v54 = vpop.f32.mrb[19].mxu0 }
 0x60e   :  { %v2984_v55 = vadd.f32 %v2983_v54, %v2982_v48 }
 0x60f   :  { %v2455_v18 = vadd.f32 %v2949_v43, %v2385_v34 }
 0x611   :  { %v2525_v59 = vadd.f32 %v2984_v55, %v2455_v18 }
 0x62b   :  { %v3017_v8 = vpop.f32.mrb[20].mxu1 }
 0x62c   :  { %v3052_v57 = vpop.f32.mrb[20].mxu0  ;;  %v3018_v60 = vpop.f32.mrb[21].mxu1 }
 0x62d   :  { %v3019_v53 = vadd.f32 %v3018_v60, %v3017_v8  ;;  %v3053_v11 = vpop.f32.mrb[21].mxu0 }
 0x62e   :  { %v3054_v0 = vadd.f32 %v3053_v11, %v3052_v57 }
 0x62f   :  { %v2595_v61 = vadd.f32 %v3019_v53, %v2525_v59 }
 0x631   :  { %v2665_v62 = vadd.f32 %v3054_v0, %v2595_v61 }
 0x633   :  { %2668 = vst [vmem:[#allocation7] sm:$0xff] %v2665_v62 }
 0x634   :  { %3603 = shalt.err (!%p3600_p6)
}
 0x635   :  { %s3604_s19 = scalar_lea.hbm %s4388_s16, 128 }
 0x636   :  { %p3605_p7 = scmp.ne.s32.totalorder %s4388_s16, %s3604_s19  ;;  %p3608_p8 = scmp.lt.u32.totalorder %s3604_s19, %s4388_s16 }
 0x638   :  { %p3610_p9 = pnand %p3608_p8, %p3605_p7 }
 0x63a   :  { %3613 = shalt.err (!%p3610_p9)
}
 0x63b   :  { %2678 = dma.vmem_to_hbm [thread:$0]  %s2676_s22, 128, %s4388_s16, [#allocation4]  }
 0x63c   :  { %3618 = dma.done.wait [#allocation4], 128  }
 0x63d   :  { %3619 = vsyncadd [#allocation4], 4294967168 }
 0x63e   :  { %2682 = vsyncpa [#allocation3], 1 }
 0x63f   :  { %2683 = vsyncpa [#allocation6], 1 }
 0x640   :  { %2684 = vsyncpa [#allocation4], 1 }

</bundles_post_ra>
